<compile_context>
chip_gen: v7x
topology: tpu7x:2x2x1
jax: 0.10.0
libtpu: 0.0.40
codegen_flags: <defaults>
</compile_context>

<pallas_src>
import functools

import jax
import jax.numpy as jnp
from jax import lax
from jax.experimental import pallas as pl
from jax.experimental.pallas import tpu as pltpu


# ----------------------------------------------------------------------------
# Fused Up kernel: upsample + concat + (conv3x3 + BN + ReLU) x 2.
# One grid step per batch image; everything channel-major (C, H*W).
# ----------------------------------------------------------------------------
def up_fused_kernel(x1_ref, x2_ref, wup_ref, mask_ref,
                    w1_ref, s1_ref, b1_ref,
                    w2_ref, s2_ref, b2_ref,
                    o_ref, *, wo):
    f32, bf16 = jnp.float32, jnp.bfloat16
    m = x2_ref.shape[2]                       # flattened output spatial (Ho*Wo)

    # Column-edge validity masks (1, m) in {0,1}; the row edges are handled by
    # the zero fill of the lane shift itself.
    mask_l = mask_ref[0:1, :]                 # zero where output col == 0      (dx = -1)
    mask_r = mask_ref[1:2, :]                 # zero where output col == wo - 1 (dx = +1)

    def shift(x, off):
        # xt[:, p] = x[:, p + off], zero-filled outside [0, m).  Static off.
        if off == 0:
            return x
        c = x.shape[0]
        z = jnp.zeros((c, abs(off)), x.dtype)
        if off > 0:
            return jnp.concatenate([x[:, off:], z], axis=1)
        return jnp.concatenate([z, x[:, :m + off]], axis=1)

    def conv3x3(x_f32, w_ref):
        # x_f32: (Cin, m) f32;  w_ref: (9, Cout, Cin) bf16  ->  (Cout, m) f32.
        acc = None
        t = 0
        for dy in (-1, 0, 1):
            for dx in (-1, 0, 1):
                xt = shift(x_f32, dy * wo + dx)
                if dx == -1:
                    xt = xt * mask_l
                elif dx == 1:
                    xt = xt * mask_r
                part = jnp.dot(w_ref[t], xt.astype(bf16),
                               preferred_element_type=f32)
                acc = part if acc is None else acc + part
                t += 1
        return acc

    # --- 1) bilinear x2 upsample as a single matmul: (C1,h*w)@(h*w,m) --------
    up = jnp.dot(x1_ref[0], wup_ref[...], preferred_element_type=f32)   # (C1, m)

    # --- 2) channel concat [x2, up]: sublane stack (vreg-aligned for f32) ----
    x_cat = jnp.concatenate([x2_ref[0].astype(f32), up], axis=0)        # (Cin, m)

    # --- 3) conv1 3x3 (9 tap dots) + folded BN + ReLU -------------------------
    y1 = conv3x3(x_cat, w1_ref)
    y1 = jnp.maximum(y1 * s1_ref[...] + b1_ref[...], 0.0)               # (Cmid, m)

    # --- 4) conv2 3x3 + folded BN + ReLU; result already (Cout, m) NCHW-flat --
    y2 = conv3x3(y1, w2_ref)
    y2 = jnp.maximum(y2 * s2_ref[...] + b2_ref[...], 0.0)               # (Cout, m)

    # --- 5) lane-dense store, no transpose needed -----------------------------
    o_ref[0] = y2.astype(o_ref.dtype)


# ----------------------------------------------------------------------------
# Host-side helpers.
# ----------------------------------------------------------------------------
def _interp_matrix(n_in, n_out):
    """Row-interpolation matrix for align_corners=True linear upsampling."""
    if n_in == 1:
        return jnp.ones((n_out, 1), jnp.float32)
    src = jnp.arange(n_out, dtype=jnp.float32) * (n_in - 1) / (n_out - 1)
    lo = jnp.clip(jnp.floor(src).astype(jnp.int32), 0, n_in - 2)
    frac = src - lo.astype(jnp.float32)
    rows = jnp.arange(n_out)
    mtx = jnp.zeros((n_out, n_in), jnp.float32)
    mtx = mtx.at[rows, lo].add(1.0 - frac)
    mtx = mtx.at[rows, lo + 1].add(frac)
    return mtx


def _upsample_matrix(h, w, ho, wo):
    """(h*w, ho*wo) bf16 matrix so that up_flat = x1_flat @ W_up (channel-major)."""
    ay = _interp_matrix(h, ho)                      # (ho, h)
    ax = _interp_matrix(w, wo)                      # (wo, w)
    return jnp.kron(ay, ax).T.astype(jnp.bfloat16)  # (h*w, ho*wo)


# ----------------------------------------------------------------------------
# Up.forward wrapper: one fused pallas_call for the whole block.
# ----------------------------------------------------------------------------
def up_forward(x1_nchw, x2_nchw, params):
    (w1, s1, b1), (w2, s2, b2) = params          # w*: (3,3,Cin,Cout) HWIO, f32
    n, c1, h, w = x1_nchw.shape
    n2, c2, ho, wo = x2_nchw.shape
    assert n == n2 and ho == 2 * h and wo == 2 * w
    cin, cmid, cout = c1 + c2, w1.shape[-1], w2.shape[-1]
    hw, m = h * w, ho * wo
    f32, bf16 = jnp.float32, jnp.bfloat16

    # NCHW -> (N, C, H*W): metadata-only reshape (no transposes); bf16 in HBM.
    x1f = x1_nchw.reshape(n, c1, hw).astype(bf16)
    x2f = x2_nchw.reshape(n, c2, m).astype(bf16)

    wup = _upsample_matrix(h, w, ho, wo)                          # (hw, m) bf16

    col = jnp.arange(m, dtype=jnp.int32) % wo
    mask = jnp.stack([(col != 0).astype(f32),
                      (col != wo - 1).astype(f32)], axis=0)       # (2, m) f32

    # Per-tap weight matrices: tap t=(ky*3+kx) -> (Cout, Cin) for (Cout,Cin)@(Cin,m).
    w1t = jnp.transpose(w1, (0, 1, 3, 2)).reshape(9, cmid, cin).astype(bf16)
    w2t = jnp.transpose(w2, (0, 1, 3, 2)).reshape(9, cout, cmid).astype(bf16)
    s1r = s1.reshape(cmid, 1).astype(f32)
    b1r = b1.reshape(cmid, 1).astype(f32)
    s2r = s2.reshape(cout, 1).astype(f32)
    b2r = b2.reshape(cout, 1).astype(f32)

    kernel = functools.partial(up_fused_kernel, wo=wo)
    out_flat = pl.pallas_call(
        kernel,
        out_shape=jax.ShapeDtypeStruct((n, cout, m), jnp.float32),
        grid=(n,),
        in_specs=[
            pl.BlockSpec((1, c1, hw), lambda i: (i, 0, 0)),       # x1 (bf16)
            pl.BlockSpec((1, c2, m), lambda i: (i, 0, 0)),        # x2 (bf16)
            pl.BlockSpec((hw, m), lambda i: (0, 0)),              # upsample matrix
            pl.BlockSpec((2, m), lambda i: (0, 0)),               # column masks
            pl.BlockSpec((9, cmid, cin), lambda i: (0, 0, 0)),    # conv1 tap weights
            pl.BlockSpec((cmid, 1), lambda i: (0, 0)),            # BN1 scale
            pl.BlockSpec((cmid, 1), lambda i: (0, 0)),            # BN1 bias
            pl.BlockSpec((9, cout, cmid), lambda i: (0, 0, 0)),   # conv2 tap weights
            pl.BlockSpec((cout, 1), lambda i: (0, 0)),            # BN2 scale
            pl.BlockSpec((cout, 1), lambda i: (0, 0)),            # BN2 bias
        ],
        out_specs=pl.BlockSpec((1, cout, m), lambda i: (i, 0, 0)),
        compiler_params=pltpu.CompilerParams(
            dimension_semantics=("parallel",)),
    )(x1f, x2f, wup, mask, w1t, s1r, b1r, w2t, s2r, b2r)

    # (N, Cout, Ho*Wo) -> (N, Cout, Ho, Wo): metadata-only reshape (already NCHW).
    return out_flat.reshape(n, cout, ho, wo)


# ----------------------------------------------------------------------------
# Parameter construction (deterministic, synthetic) + pure-JAX reference.
# ----------------------------------------------------------------------------
def make_conv_bn_params(key, cin, cout, eps=1e-5):
    ks = jax.random.split(key, 6)
    w = 0.1 * jax.random.normal(ks[0], (3, 3, cin, cout), jnp.float32)   # HWIO
    b = 0.1 * jax.random.normal(ks[1], (cout,), jnp.float32)
    gamma = jax.random.uniform(ks[2], (cout,), jnp.float32, 0.5, 1.5)
    beta = 0.1 * jax.random.normal(ks[3], (cout,), jnp.float32)
    r_mean = 0.1 * jax.random.normal(ks[4], (cout,), jnp.float32)
    r_var = jax.random.uniform(ks[5], (cout,), jnp.float32, 0.5, 1.5)
    scale = gamma / jnp.sqrt(r_var + eps)             # folded BN (eval mode)
    bias = (b - r_mean) * scale + beta
    return w, scale, bias


def up_forward_ref(x1_nchw, x2_nchw, params):
    """Pure-JAX/XLA reference using the same bf16-operand / f32-accum recipe."""
    (w1, s1, b1), (w2, s2, b2) = params
    f32, bf16 = jnp.float32, jnp.bfloat16
    n, c1, h, w = x1_nchw.shape
    _, _, ho, wo = x2_nchw.shape

    wup = _upsample_matrix(h, w, ho, wo)
    up = jnp.einsum("nck,km->ncm",
                    x1_nchw.reshape(n, c1, h * w).astype(bf16), wup,
                    preferred_element_type=f32).reshape(n, c1, ho, wo)
    x = jnp.concatenate([x2_nchw, up], axis=1)        # NCHW

    def conv_bn_relu(xv, wt, s, b):
        y = lax.conv_general_dilated(
            xv.astype(bf16), wt.astype(bf16), window_strides=(1, 1),
            padding="SAME", dimension_numbers=("NCHW", "HWIO", "NCHW"),
            preferred_element_type=f32)
        return jnp.maximum(
            y * s.reshape(1, -1, 1, 1) + b.reshape(1, -1, 1, 1), 0.0)

    y = conv_bn_relu(x, w1, s1, b1)
    y = conv_bn_relu(y, w2, s2, b2)
    return y


if __name__ == "__main__":
    key = jax.random.PRNGKey(0)
    k_x1, k_x2, k_p1, k_p2 = jax.random.split(key, 4)

    # Up(in_channels=16, out_channels=8), bilinear=True: x1 has 8 channels at
    # half resolution, x2 has 8 channels at full resolution; cat -> 16 channels.
    n, c1, h, w = 4, 8, 8, 8
    c2 = 8
    in_channels = c1 + c2
    out_channels = 8

    x1 = jax.random.normal(k_x1, (n, c1, h, w), jnp.float32)            # NCHW
    x2 = jax.random.normal(k_x2, (n, c2, 2 * h, 2 * w), jnp.float32)    # NCHW

    params = (
        make_conv_bn_params(k_p1, in_channels, out_channels),
        make_conv_bn_params(k_p2, out_channels, out_channels),
    )

    out = jax.block_until_ready(up_forward(x1, x2, params))
    assert out.shape == (n, out_channels, 2 * h, 2 * w), out.shape

    ref = jax.block_until_ready(up_forward_ref(x1, x2, params))
    err = float(jnp.max(jnp.abs(out - ref)))
    assert jnp.allclose(out, ref, atol=1e-2, rtol=1e-2), err

    print("KERNEL_OK")
</pallas_src>

<mosaic_0001>
module attributes {stable_mosaic.version = 11 : i64} {
  func.func @up_fused_kernel(%arg0: i32, %arg1: memref<1x8x64xbf16, #tpu.memory_space<vmem>>, %arg2: memref<1x8x256xbf16, #tpu.memory_space<vmem>>, %arg3: memref<64x256xbf16, #tpu.memory_space<vmem>>, %arg4: memref<2x256xf32, #tpu.memory_space<vmem>>, %arg5: memref<9x8x16xbf16, #tpu.memory_space<vmem>>, %arg6: memref<8x1xf32, #tpu.memory_space<vmem>>, %arg7: memref<8x1xf32, #tpu.memory_space<vmem>>, %arg8: memref<9x8x8xbf16, #tpu.memory_space<vmem>>, %arg9: memref<8x1xf32, #tpu.memory_space<vmem>>, %arg10: memref<8x1xf32, #tpu.memory_space<vmem>>, %arg11: memref<1x8x256xf32, #tpu.memory_space<vmem>>) attributes {dimension_semantics = [#tpu.dimension_semantics<parallel>], iteration_bounds = array<i64: 4>, scalar_prefetch = 0 : i64, scratch_operands = 0 : i64, tpu.core_type = #tpu.core_type<tc>, window_params = [{transform_indices = @transform_0, window_bounds = array<i64: 1, 8, 64>}, {transform_indices = @transform_1, window_bounds = array<i64: 1, 8, 256>}, {pipeline_mode = #tpu.pipeline_mode<synchronous>, transform_indices = @transform_2, window_bounds = array<i64: 64, 256>}, {pipeline_mode = #tpu.pipeline_mode<synchronous>, transform_indices = @transform_3, window_bounds = array<i64: 2, 256>}, {pipeline_mode = #tpu.pipeline_mode<synchronous>, transform_indices = @transform_4, window_bounds = array<i64: 9, 8, 16>}, {pipeline_mode = #tpu.pipeline_mode<synchronous>, transform_indices = @transform_5, window_bounds = array<i64: 8, 1>}, {pipeline_mode = #tpu.pipeline_mode<synchronous>, transform_indices = @transform_6, window_bounds = array<i64: 8, 1>}, {pipeline_mode = #tpu.pipeline_mode<synchronous>, transform_indices = @transform_7, window_bounds = array<i64: 9, 8, 8>}, {pipeline_mode = #tpu.pipeline_mode<synchronous>, transform_indices = @transform_8, window_bounds = array<i64: 8, 1>}, {pipeline_mode = #tpu.pipeline_mode<synchronous>, transform_indices = @transform_9, window_bounds = array<i64: 8, 1>}, {transform_indices = @transform_10, window_bounds = array<i64: 1, 8, 256>}]} {
    %c0 = arith.constant 0 : index
    %c0_0 = arith.constant 0 : index
    %0 = vector.load %arg4[%c0, %c0_0] : memref<2x256xf32, #tpu.memory_space<vmem>>, vector<1x256xf32>
    %c1 = arith.constant 1 : index
    %c0_1 = arith.constant 0 : index
    %1 = vector.load %arg4[%c1, %c0_1] : memref<2x256xf32, #tpu.memory_space<vmem>>, vector<1x256xf32>
    %c0_2 = arith.constant 0 : index
    %c0_3 = arith.constant 0 : index
    %c0_4 = arith.constant 0 : index
    %2 = vector.load %arg1[%c0_2, %c0_3, %c0_4] : memref<1x8x64xbf16, #tpu.memory_space<vmem>>, vector<1x8x64xbf16>
    %3 = vector.shape_cast %2 : vector<1x8x64xbf16> to vector<8x64xbf16>
    %c0_5 = arith.constant 0 : index
    %c0_6 = arith.constant 0 : index
    %4 = vector.load %arg3[%c0_5, %c0_6] : memref<64x256xbf16, #tpu.memory_space<vmem>>, vector<64x256xbf16>
    %cst = arith.constant dense<0.000000e+00> : vector<8x256xf32>
    %5 = tpu.matmul %3, %4, %cst {dimension_numbers = #tpu.dot_dimension_numbers<[1], [0], [0], [1], [0, 0, 1, 1], [], []>} : vector<8x64xbf16>, vector<64x256xbf16>, vector<8x256xf32> -> vector<8x256xf32>
    %c0_7 = arith.constant 0 : index
    %c0_8 = arith.constant 0 : index
    %c0_9 = arith.constant 0 : index
    %6 = vector.load %arg2[%c0_7, %c0_8, %c0_9] : memref<1x8x256xbf16, #tpu.memory_space<vmem>>, vector<1x8x256xbf16>
    %7 = vector.shape_cast %6 : vector<1x8x256xbf16> to vector<8x256xbf16>
    %8 = arith.extf %7 : vector<8x256xbf16> to vector<8x256xf32>
    %9 = tpu.concatenate %8, %5 in 0 : vector<8x256xf32>, vector<8x256xf32> -> vector<16x256xf32>
    %cst_10 = arith.constant 0.000000e+00 : f32
    %10 = vector.broadcast %cst_10 : f32 to vector<16x17xf32>
    %11 = vector.extract_strided_slice %9 {offsets = [0, 0], sizes = [16, 239], strides = [1, 1]} : vector<16x256xf32> to vector<16x239xf32>
    %12 = tpu.concatenate %10, %11 in 1 : vector<16x17xf32>, vector<16x239xf32> -> vector<16x256xf32>
    %13 = vector.broadcast %0 : vector<1x256xf32> to vector<16x256xf32>
    %14 = arith.mulf %12, %13 : vector<16x256xf32>
    %c0_11 = arith.constant 0 : index
    %c0_12 = arith.constant 0 : index
    %c0_13 = arith.constant 0 : index
    %15 = vector.load %arg5[%c0_11, %c0_12, %c0_13] : memref<9x8x16xbf16, #tpu.memory_space<vmem>>, vector<1x8x16xbf16>
    %16 = vector.shape_cast %15 : vector<1x8x16xbf16> to vector<8x16xbf16>
    %17 = arith.truncf %14 : vector<16x256xf32> to vector<16x256xbf16>
    %cst_14 = arith.constant dense<0.000000e+00> : vector<8x256xf32>
    %18 = tpu.matmul %16, %17, %cst_14 {dimension_numbers = #tpu.dot_dimension_numbers<[1], [0], [0], [1], [0, 0, 1, 1], [], []>} : vector<8x16xbf16>, vector<16x256xbf16>, vector<8x256xf32> -> vector<8x256xf32>
    %cst_15 = arith.constant 0.000000e+00 : f32
    %19 = vector.broadcast %cst_15 : f32 to vector<16x16xf32>
    %20 = vector.extract_strided_slice %9 {offsets = [0, 0], sizes = [16, 240], strides = [1, 1]} : vector<16x256xf32> to vector<16x240xf32>
    %21 = tpu.concatenate %19, %20 in 1 : vector<16x16xf32>, vector<16x240xf32> -> vector<16x256xf32>
    %c1_16 = arith.constant 1 : index
    %c0_17 = arith.constant 0 : index
    %c0_18 = arith.constant 0 : index
    %22 = vector.load %arg5[%c1_16, %c0_17, %c0_18] : memref<9x8x16xbf16, #tpu.memory_space<vmem>>, vector<1x8x16xbf16>
    %23 = vector.shape_cast %22 : vector<1x8x16xbf16> to vector<8x16xbf16>
    %24 = arith.truncf %21 : vector<16x256xf32> to vector<16x256xbf16>
    %cst_19 = arith.constant dense<0.000000e+00> : vector<8x256xf32>
    %25 = tpu.matmul %23, %24, %cst_19 {dimension_numbers = #tpu.dot_dimension_numbers<[1], [0], [0], [1], [0, 0, 1, 1], [], []>} : vector<8x16xbf16>, vector<16x256xbf16>, vector<8x256xf32> -> vector<8x256xf32>
    %26 = arith.addf %18, %25 : vector<8x256xf32>
    %cst_20 = arith.constant 0.000000e+00 : f32
    %27 = vector.broadcast %cst_20 : f32 to vector<16x15xf32>
    %28 = vector.extract_strided_slice %9 {offsets = [0, 0], sizes = [16, 241], strides = [1, 1]} : vector<16x256xf32> to vector<16x241xf32>
    %29 = tpu.concatenate %27, %28 in 1 : vector<16x15xf32>, vector<16x241xf32> -> vector<16x256xf32>
    %30 = vector.broadcast %1 : vector<1x256xf32> to vector<16x256xf32>
    %31 = arith.mulf %29, %30 : vector<16x256xf32>
    %c2 = arith.constant 2 : index
    %c0_21 = arith.constant 0 : index
    %c0_22 = arith.constant 0 : index
    %32 = vector.load %arg5[%c2, %c0_21, %c0_22] : memref<9x8x16xbf16, #tpu.memory_space<vmem>>, vector<1x8x16xbf16>
    %33 = vector.shape_cast %32 : vector<1x8x16xbf16> to vector<8x16xbf16>
    %34 = arith.truncf %31 : vector<16x256xf32> to vector<16x256xbf16>
    %cst_23 = arith.constant dense<0.000000e+00> : vector<8x256xf32>
    %35 = tpu.matmul %33, %34, %cst_23 {dimension_numbers = #tpu.dot_dimension_numbers<[1], [0], [0], [1], [0, 0, 1, 1], [], []>} : vector<8x16xbf16>, vector<16x256xbf16>, vector<8x256xf32> -> vector<8x256xf32>
    %36 = arith.addf %26, %35 : vector<8x256xf32>
    %cst_24 = arith.constant 0.000000e+00 : f32
    %37 = vector.broadcast %cst_24 : f32 to vector<16x1xf32>
    %38 = vector.extract_strided_slice %9 {offsets = [0, 0], sizes = [16, 255], strides = [1, 1]} : vector<16x256xf32> to vector<16x255xf32>
    %39 = tpu.concatenate %37, %38 in 1 : vector<16x1xf32>, vector<16x255xf32> -> vector<16x256xf32>
    %40 = vector.broadcast %0 : vector<1x256xf32> to vector<16x256xf32>
    %41 = arith.mulf %39, %40 : vector<16x256xf32>
    %c3 = arith.constant 3 : index
    %c0_25 = arith.constant 0 : index
    %c0_26 = arith.constant 0 : index
    %42 = vector.load %arg5[%c3, %c0_25, %c0_26] : memref<9x8x16xbf16, #tpu.memory_space<vmem>>, vector<1x8x16xbf16>
    %43 = vector.shape_cast %42 : vector<1x8x16xbf16> to vector<8x16xbf16>
    %44 = arith.truncf %41 : vector<16x256xf32> to vector<16x256xbf16>
    %cst_27 = arith.constant dense<0.000000e+00> : vector<8x256xf32>
    %45 = tpu.matmul %43, %44, %cst_27 {dimension_numbers = #tpu.dot_dimension_numbers<[1], [0], [0], [1], [0, 0, 1, 1], [], []>} : vector<8x16xbf16>, vector<16x256xbf16>, vector<8x256xf32> -> vector<8x256xf32>
    %46 = arith.addf %36, %45 : vector<8x256xf32>
    %c4 = arith.constant 4 : index
    %c0_28 = arith.constant 0 : index
    %c0_29 = arith.constant 0 : index
    %47 = vector.load %arg5[%c4, %c0_28, %c0_29] : memref<9x8x16xbf16, #tpu.memory_space<vmem>>, vector<1x8x16xbf16>
    %48 = vector.shape_cast %47 : vector<1x8x16xbf16> to vector<8x16xbf16>
    %49 = arith.truncf %9 : vector<16x256xf32> to vector<16x256xbf16>
    %cst_30 = arith.constant dense<0.000000e+00> : vector<8x256xf32>
    %50 = tpu.matmul %48, %49, %cst_30 {dimension_numbers = #tpu.dot_dimension_numbers<[1], [0], [0], [1], [0, 0, 1, 1], [], []>} : vector<8x16xbf16>, vector<16x256xbf16>, vector<8x256xf32> -> vector<8x256xf32>
    %51 = arith.addf %46, %50 : vector<8x256xf32>
    %cst_31 = arith.constant 0.000000e+00 : f32
    %52 = vector.broadcast %cst_31 : f32 to vector<16x1xf32>
    %53 = vector.extract_strided_slice %9 {offsets = [0, 1], sizes = [16, 255], strides = [1, 1]} : vector<16x256xf32> to vector<16x255xf32>
    %54 = tpu.concatenate %53, %52 in 1 : vector<16x255xf32>, vector<16x1xf32> -> vector<16x256xf32>
    %55 = vector.broadcast %1 : vector<1x256xf32> to vector<16x256xf32>
    %56 = arith.mulf %54, %55 : vector<16x256xf32>
    %c5 = arith.constant 5 : index
    %c0_32 = arith.constant 0 : index
    %c0_33 = arith.constant 0 : index
    %57 = vector.load %arg5[%c5, %c0_32, %c0_33] : memref<9x8x16xbf16, #tpu.memory_space<vmem>>, vector<1x8x16xbf16>
    %58 = vector.shape_cast %57 : vector<1x8x16xbf16> to vector<8x16xbf16>
    %59 = arith.truncf %56 : vector<16x256xf32> to vector<16x256xbf16>
    %cst_34 = arith.constant dense<0.000000e+00> : vector<8x256xf32>
    %60 = tpu.matmul %58, %59, %cst_34 {dimension_numbers = #tpu.dot_dimension_numbers<[1], [0], [0], [1], [0, 0, 1, 1], [], []>} : vector<8x16xbf16>, vector<16x256xbf16>, vector<8x256xf32> -> vector<8x256xf32>
    %61 = arith.addf %51, %60 : vector<8x256xf32>
    %cst_35 = arith.constant 0.000000e+00 : f32
    %62 = vector.broadcast %cst_35 : f32 to vector<16x15xf32>
    %63 = vector.extract_strided_slice %9 {offsets = [0, 15], sizes = [16, 241], strides = [1, 1]} : vector<16x256xf32> to vector<16x241xf32>
    %64 = tpu.concatenate %63, %62 in 1 : vector<16x241xf32>, vector<16x15xf32> -> vector<16x256xf32>
    %65 = vector.broadcast %0 : vector<1x256xf32> to vector<16x256xf32>
    %66 = arith.mulf %64, %65 : vector<16x256xf32>
    %c6 = arith.constant 6 : index
    %c0_36 = arith.constant 0 : index
    %c0_37 = arith.constant 0 : index
    %67 = vector.load %arg5[%c6, %c0_36, %c0_37] : memref<9x8x16xbf16, #tpu.memory_space<vmem>>, vector<1x8x16xbf16>
    %68 = vector.shape_cast %67 : vector<1x8x16xbf16> to vector<8x16xbf16>
    %69 = arith.truncf %66 : vector<16x256xf32> to vector<16x256xbf16>
    %cst_38 = arith.constant dense<0.000000e+00> : vector<8x256xf32>
    %70 = tpu.matmul %68, %69, %cst_38 {dimension_numbers = #tpu.dot_dimension_numbers<[1], [0], [0], [1], [0, 0, 1, 1], [], []>} : vector<8x16xbf16>, vector<16x256xbf16>, vector<8x256xf32> -> vector<8x256xf32>
    %71 = arith.addf %61, %70 : vector<8x256xf32>
    %cst_39 = arith.constant 0.000000e+00 : f32
    %72 = vector.broadcast %cst_39 : f32 to vector<16x16xf32>
    %73 = vector.extract_strided_slice %9 {offsets = [0, 16], sizes = [16, 240], strides = [1, 1]} : vector<16x256xf32> to vector<16x240xf32>
    %74 = tpu.concatenate %73, %72 in 1 : vector<16x240xf32>, vector<16x16xf32> -> vector<16x256xf32>
    %c7 = arith.constant 7 : index
    %c0_40 = arith.constant 0 : index
    %c0_41 = arith.constant 0 : index
    %75 = vector.load %arg5[%c7, %c0_40, %c0_41] : memref<9x8x16xbf16, #tpu.memory_space<vmem>>, vector<1x8x16xbf16>
    %76 = vector.shape_cast %75 : vector<1x8x16xbf16> to vector<8x16xbf16>
    %77 = arith.truncf %74 : vector<16x256xf32> to vector<16x256xbf16>
    %cst_42 = arith.constant dense<0.000000e+00> : vector<8x256xf32>
    %78 = tpu.matmul %76, %77, %cst_42 {dimension_numbers = #tpu.dot_dimension_numbers<[1], [0], [0], [1], [0, 0, 1, 1], [], []>} : vector<8x16xbf16>, vector<16x256xbf16>, vector<8x256xf32> -> vector<8x256xf32>
    %79 = arith.addf %71, %78 : vector<8x256xf32>
    %cst_43 = arith.constant 0.000000e+00 : f32
    %80 = vector.broadcast %cst_43 : f32 to vector<16x17xf32>
    %81 = vector.extract_strided_slice %9 {offsets = [0, 17], sizes = [16, 239], strides = [1, 1]} : vector<16x256xf32> to vector<16x239xf32>
    %82 = tpu.concatenate %81, %80 in 1 : vector<16x239xf32>, vector<16x17xf32> -> vector<16x256xf32>
    %83 = vector.broadcast %1 : vector<1x256xf32> to vector<16x256xf32>
    %84 = arith.mulf %82, %83 : vector<16x256xf32>
    %c8 = arith.constant 8 : index
    %c0_44 = arith.constant 0 : index
    %c0_45 = arith.constant 0 : index
    %85 = vector.load %arg5[%c8, %c0_44, %c0_45] : memref<9x8x16xbf16, #tpu.memory_space<vmem>>, vector<1x8x16xbf16>
    %86 = vector.shape_cast %85 : vector<1x8x16xbf16> to vector<8x16xbf16>
    %87 = arith.truncf %84 : vector<16x256xf32> to vector<16x256xbf16>
    %cst_46 = arith.constant dense<0.000000e+00> : vector<8x256xf32>
    %88 = tpu.matmul %86, %87, %cst_46 {dimension_numbers = #tpu.dot_dimension_numbers<[1], [0], [0], [1], [0, 0, 1, 1], [], []>} : vector<8x16xbf16>, vector<16x256xbf16>, vector<8x256xf32> -> vector<8x256xf32>
    %89 = arith.addf %79, %88 : vector<8x256xf32>
    %c0_47 = arith.constant 0 : index
    %c0_48 = arith.constant 0 : index
    %90 = vector.load %arg6[%c0_47, %c0_48] : memref<8x1xf32, #tpu.memory_space<vmem>>, vector<8x1xf32>
    %91 = vector.broadcast %90 : vector<8x1xf32> to vector<8x256xf32>
    %92 = arith.mulf %89, %91 : vector<8x256xf32>
    %c0_49 = arith.constant 0 : index
    %c0_50 = arith.constant 0 : index
    %93 = vector.load %arg7[%c0_49, %c0_50] : memref<8x1xf32, #tpu.memory_space<vmem>>, vector<8x1xf32>
    %94 = vector.broadcast %93 : vector<8x1xf32> to vector<8x256xf32>
    %95 = arith.addf %92, %94 : vector<8x256xf32>
    %cst_51 = arith.constant 0.000000e+00 : f32
    %96 = vector.broadcast %cst_51 : f32 to vector<8x256xf32>
    %97 = arith.maximumf %95, %96 : vector<8x256xf32>
    %cst_52 = arith.constant 0.000000e+00 : f32
    %98 = vector.broadcast %cst_52 : f32 to vector<8x17xf32>
    %99 = vector.extract_strided_slice %97 {offsets = [0, 0], sizes = [8, 239], strides = [1, 1]} : vector<8x256xf32> to vector<8x239xf32>
    %100 = tpu.concatenate %98, %99 in 1 : vector<8x17xf32>, vector<8x239xf32> -> vector<8x256xf32>
    %101 = vector.broadcast %0 : vector<1x256xf32> to vector<8x256xf32>
    %102 = arith.mulf %100, %101 : vector<8x256xf32>
    %c0_53 = arith.constant 0 : index
    %c0_54 = arith.constant 0 : index
    %c0_55 = arith.constant 0 : index
    %103 = vector.load %arg8[%c0_53, %c0_54, %c0_55] : memref<9x8x8xbf16, #tpu.memory_space<vmem>>, vector<1x8x8xbf16>
    %104 = vector.shape_cast %103 : vector<1x8x8xbf16> to vector<8x8xbf16>
    %105 = arith.truncf %102 : vector<8x256xf32> to vector<8x256xbf16>
    %cst_56 = arith.constant dense<0.000000e+00> : vector<8x256xf32>
    %106 = tpu.matmul %104, %105, %cst_56 {dimension_numbers = #tpu.dot_dimension_numbers<[1], [0], [0], [1], [0, 0, 1, 1], [], []>} : vector<8x8xbf16>, vector<8x256xbf16>, vector<8x256xf32> -> vector<8x256xf32>
    %cst_57 = arith.constant 0.000000e+00 : f32
    %107 = vector.broadcast %cst_57 : f32 to vector<8x16xf32>
    %108 = vector.extract_strided_slice %97 {offsets = [0, 0], sizes = [8, 240], strides = [1, 1]} : vector<8x256xf32> to vector<8x240xf32>
    %109 = tpu.concatenate %107, %108 in 1 : vector<8x16xf32>, vector<8x240xf32> -> vector<8x256xf32>
    %c1_58 = arith.constant 1 : index
    %c0_59 = arith.constant 0 : index
    %c0_60 = arith.constant 0 : index
    %110 = vector.load %arg8[%c1_58, %c0_59, %c0_60] : memref<9x8x8xbf16, #tpu.memory_space<vmem>>, vector<1x8x8xbf16>
    %111 = vector.shape_cast %110 : vector<1x8x8xbf16> to vector<8x8xbf16>
    %112 = arith.truncf %109 : vector<8x256xf32> to vector<8x256xbf16>
    %cst_61 = arith.constant dense<0.000000e+00> : vector<8x256xf32>
    %113 = tpu.matmul %111, %112, %cst_61 {dimension_numbers = #tpu.dot_dimension_numbers<[1], [0], [0], [1], [0, 0, 1, 1], [], []>} : vector<8x8xbf16>, vector<8x256xbf16>, vector<8x256xf32> -> vector<8x256xf32>
    %114 = arith.addf %106, %113 : vector<8x256xf32>
    %cst_62 = arith.constant 0.000000e+00 : f32
    %115 = vector.broadcast %cst_62 : f32 to vector<8x15xf32>
    %116 = vector.extract_strided_slice %97 {offsets = [0, 0], sizes = [8, 241], strides = [1, 1]} : vector<8x256xf32> to vector<8x241xf32>
    %117 = tpu.concatenate %115, %116 in 1 : vector<8x15xf32>, vector<8x241xf32> -> vector<8x256xf32>
    %118 = vector.broadcast %1 : vector<1x256xf32> to vector<8x256xf32>
    %119 = arith.mulf %117, %118 : vector<8x256xf32>
    %c2_63 = arith.constant 2 : index
    %c0_64 = arith.constant 0 : index
    %c0_65 = arith.constant 0 : index
    %120 = vector.load %arg8[%c2_63, %c0_64, %c0_65] : memref<9x8x8xbf16, #tpu.memory_space<vmem>>, vector<1x8x8xbf16>
    %121 = vector.shape_cast %120 : vector<1x8x8xbf16> to vector<8x8xbf16>
    %122 = arith.truncf %119 : vector<8x256xf32> to vector<8x256xbf16>
    %cst_66 = arith.constant dense<0.000000e+00> : vector<8x256xf32>
    %123 = tpu.matmul %121, %122, %cst_66 {dimension_numbers = #tpu.dot_dimension_numbers<[1], [0], [0], [1], [0, 0, 1, 1], [], []>} : vector<8x8xbf16>, vector<8x256xbf16>, vector<8x256xf32> -> vector<8x256xf32>
    %124 = arith.addf %114, %123 : vector<8x256xf32>
    %cst_67 = arith.constant 0.000000e+00 : f32
    %125 = vector.broadcast %cst_67 : f32 to vector<8x1xf32>
    %126 = vector.extract_strided_slice %97 {offsets = [0, 0], sizes = [8, 255], strides = [1, 1]} : vector<8x256xf32> to vector<8x255xf32>
    %127 = tpu.concatenate %125, %126 in 1 : vector<8x1xf32>, vector<8x255xf32> -> vector<8x256xf32>
    %128 = vector.broadcast %0 : vector<1x256xf32> to vector<8x256xf32>
    %129 = arith.mulf %127, %128 : vector<8x256xf32>
    %c3_68 = arith.constant 3 : index
    %c0_69 = arith.constant 0 : index
    %c0_70 = arith.constant 0 : index
    %130 = vector.load %arg8[%c3_68, %c0_69, %c0_70] : memref<9x8x8xbf16, #tpu.memory_space<vmem>>, vector<1x8x8xbf16>
    %131 = vector.shape_cast %130 : vector<1x8x8xbf16> to vector<8x8xbf16>
    %132 = arith.truncf %129 : vector<8x256xf32> to vector<8x256xbf16>
    %cst_71 = arith.constant dense<0.000000e+00> : vector<8x256xf32>
    %133 = tpu.matmul %131, %132, %cst_71 {dimension_numbers = #tpu.dot_dimension_numbers<[1], [0], [0], [1], [0, 0, 1, 1], [], []>} : vector<8x8xbf16>, vector<8x256xbf16>, vector<8x256xf32> -> vector<8x256xf32>
    %134 = arith.addf %124, %133 : vector<8x256xf32>
    %c4_72 = arith.constant 4 : index
    %c0_73 = arith.constant 0 : index
    %c0_74 = arith.constant 0 : index
    %135 = vector.load %arg8[%c4_72, %c0_73, %c0_74] : memref<9x8x8xbf16, #tpu.memory_space<vmem>>, vector<1x8x8xbf16>
    %136 = vector.shape_cast %135 : vector<1x8x8xbf16> to vector<8x8xbf16>
    %137 = arith.truncf %97 : vector<8x256xf32> to vector<8x256xbf16>
    %cst_75 = arith.constant dense<0.000000e+00> : vector<8x256xf32>
    %138 = tpu.matmul %136, %137, %cst_75 {dimension_numbers = #tpu.dot_dimension_numbers<[1], [0], [0], [1], [0, 0, 1, 1], [], []>} : vector<8x8xbf16>, vector<8x256xbf16>, vector<8x256xf32> -> vector<8x256xf32>
    %139 = arith.addf %134, %138 : vector<8x256xf32>
    %cst_76 = arith.constant 0.000000e+00 : f32
    %140 = vector.broadcast %cst_76 : f32 to vector<8x1xf32>
    %141 = vector.extract_strided_slice %97 {offsets = [0, 1], sizes = [8, 255], strides = [1, 1]} : vector<8x256xf32> to vector<8x255xf32>
    %142 = tpu.concatenate %141, %140 in 1 : vector<8x255xf32>, vector<8x1xf32> -> vector<8x256xf32>
    %143 = vector.broadcast %1 : vector<1x256xf32> to vector<8x256xf32>
    %144 = arith.mulf %142, %143 : vector<8x256xf32>
    %c5_77 = arith.constant 5 : index
    %c0_78 = arith.constant 0 : index
    %c0_79 = arith.constant 0 : index
    %145 = vector.load %arg8[%c5_77, %c0_78, %c0_79] : memref<9x8x8xbf16, #tpu.memory_space<vmem>>, vector<1x8x8xbf16>
    %146 = vector.shape_cast %145 : vector<1x8x8xbf16> to vector<8x8xbf16>
    %147 = arith.truncf %144 : vector<8x256xf32> to vector<8x256xbf16>
    %cst_80 = arith.constant dense<0.000000e+00> : vector<8x256xf32>
    %148 = tpu.matmul %146, %147, %cst_80 {dimension_numbers = #tpu.dot_dimension_numbers<[1], [0], [0], [1], [0, 0, 1, 1], [], []>} : vector<8x8xbf16>, vector<8x256xbf16>, vector<8x256xf32> -> vector<8x256xf32>
    %149 = arith.addf %139, %148 : vector<8x256xf32>
    %cst_81 = arith.constant 0.000000e+00 : f32
    %150 = vector.broadcast %cst_81 : f32 to vector<8x15xf32>
    %151 = vector.extract_strided_slice %97 {offsets = [0, 15], sizes = [8, 241], strides = [1, 1]} : vector<8x256xf32> to vector<8x241xf32>
    %152 = tpu.concatenate %151, %150 in 1 : vector<8x241xf32>, vector<8x15xf32> -> vector<8x256xf32>
    %153 = vector.broadcast %0 : vector<1x256xf32> to vector<8x256xf32>
    %154 = arith.mulf %152, %153 : vector<8x256xf32>
    %c6_82 = arith.constant 6 : index
    %c0_83 = arith.constant 0 : index
    %c0_84 = arith.constant 0 : index
    %155 = vector.load %arg8[%c6_82, %c0_83, %c0_84] : memref<9x8x8xbf16, #tpu.memory_space<vmem>>, vector<1x8x8xbf16>
    %156 = vector.shape_cast %155 : vector<1x8x8xbf16> to vector<8x8xbf16>
    %157 = arith.truncf %154 : vector<8x256xf32> to vector<8x256xbf16>
    %cst_85 = arith.constant dense<0.000000e+00> : vector<8x256xf32>
    %158 = tpu.matmul %156, %157, %cst_85 {dimension_numbers = #tpu.dot_dimension_numbers<[1], [0], [0], [1], [0, 0, 1, 1], [], []>} : vector<8x8xbf16>, vector<8x256xbf16>, vector<8x256xf32> -> vector<8x256xf32>
    %159 = arith.addf %149, %158 : vector<8x256xf32>
    %cst_86 = arith.constant 0.000000e+00 : f32
    %160 = vector.broadcast %cst_86 : f32 to vector<8x16xf32>
    %161 = vector.extract_strided_slice %97 {offsets = [0, 16], sizes = [8, 240], strides = [1, 1]} : vector<8x256xf32> to vector<8x240xf32>
    %162 = tpu.concatenate %161, %160 in 1 : vector<8x240xf32>, vector<8x16xf32> -> vector<8x256xf32>
    %c7_87 = arith.constant 7 : index
    %c0_88 = arith.constant 0 : index
    %c0_89 = arith.constant 0 : index
    %163 = vector.load %arg8[%c7_87, %c0_88, %c0_89] : memref<9x8x8xbf16, #tpu.memory_space<vmem>>, vector<1x8x8xbf16>
    %164 = vector.shape_cast %163 : vector<1x8x8xbf16> to vector<8x8xbf16>
    %165 = arith.truncf %162 : vector<8x256xf32> to vector<8x256xbf16>
    %cst_90 = arith.constant dense<0.000000e+00> : vector<8x256xf32>
    %166 = tpu.matmul %164, %165, %cst_90 {dimension_numbers = #tpu.dot_dimension_numbers<[1], [0], [0], [1], [0, 0, 1, 1], [], []>} : vector<8x8xbf16>, vector<8x256xbf16>, vector<8x256xf32> -> vector<8x256xf32>
    %167 = arith.addf %159, %166 : vector<8x256xf32>
    %cst_91 = arith.constant 0.000000e+00 : f32
    %168 = vector.broadcast %cst_91 : f32 to vector<8x17xf32>
    %169 = vector.extract_strided_slice %97 {offsets = [0, 17], sizes = [8, 239], strides = [1, 1]} : vector<8x256xf32> to vector<8x239xf32>
    %170 = tpu.concatenate %169, %168 in 1 : vector<8x239xf32>, vector<8x17xf32> -> vector<8x256xf32>
    %171 = vector.broadcast %1 : vector<1x256xf32> to vector<8x256xf32>
    %172 = arith.mulf %170, %171 : vector<8x256xf32>
    %c8_92 = arith.constant 8 : index
    %c0_93 = arith.constant 0 : index
    %c0_94 = arith.constant 0 : index
    %173 = vector.load %arg8[%c8_92, %c0_93, %c0_94] : memref<9x8x8xbf16, #tpu.memory_space<vmem>>, vector<1x8x8xbf16>
    %174 = vector.shape_cast %173 : vector<1x8x8xbf16> to vector<8x8xbf16>
    %175 = arith.truncf %172 : vector<8x256xf32> to vector<8x256xbf16>
    %cst_95 = arith.constant dense<0.000000e+00> : vector<8x256xf32>
    %176 = tpu.matmul %174, %175, %cst_95 {dimension_numbers = #tpu.dot_dimension_numbers<[1], [0], [0], [1], [0, 0, 1, 1], [], []>} : vector<8x8xbf16>, vector<8x256xbf16>, vector<8x256xf32> -> vector<8x256xf32>
    %177 = arith.addf %167, %176 : vector<8x256xf32>
    %c0_96 = arith.constant 0 : index
    %c0_97 = arith.constant 0 : index
    %178 = vector.load %arg9[%c0_96, %c0_97] : memref<8x1xf32, #tpu.memory_space<vmem>>, vector<8x1xf32>
    %179 = vector.broadcast %178 : vector<8x1xf32> to vector<8x256xf32>
    %180 = arith.mulf %177, %179 : vector<8x256xf32>
    %c0_98 = arith.constant 0 : index
    %c0_99 = arith.constant 0 : index
    %181 = vector.load %arg10[%c0_98, %c0_99] : memref<8x1xf32, #tpu.memory_space<vmem>>, vector<8x1xf32>
    %182 = vector.broadcast %181 : vector<8x1xf32> to vector<8x256xf32>
    %183 = arith.addf %180, %182 : vector<8x256xf32>
    %cst_100 = arith.constant 0.000000e+00 : f32
    %184 = vector.broadcast %cst_100 : f32 to vector<8x256xf32>
    %185 = arith.maximumf %183, %184 : vector<8x256xf32>
    %c0_101 = arith.constant 0 : index
    %c0_102 = arith.constant 0 : index
    %c0_103 = arith.constant 0 : index
    %186 = vector.load %arg11[%c0_101, %c0_102, %c0_103] : memref<1x8x256xf32, #tpu.memory_space<vmem>>, vector<1x8x256xf32>
    %187 = vector.shape_cast %186 : vector<1x8x256xf32> to vector<8x256xf32>
    %188 = vector.shape_cast %185 : vector<8x256xf32> to vector<1x8x256xf32>
    tpu.vector_store %arg11[%c0_101, %c0_102, %c0_103], %188 {strides = array<i32>} : memref<1x8x256xf32, #tpu.memory_space<vmem>>, vector<1x8x256xf32>,
    return
  }
  func.func @transform_0(%arg0: i32) -> (i32, i32, i32) {
    %c0_i32 = arith.constant 0 : i32
    %c0_i32_0 = arith.constant 0 : i32
    %c0_i32_1 = arith.constant 0 : i32
    return %arg0, %c0_i32, %c0_i32_0 : i32, i32, i32
  }
  func.func @transform_1(%arg0: i32) -> (i32, i32, i32) {
    %c0_i32 = arith.constant 0 : i32
    %c0_i32_0 = arith.constant 0 : i32
    %c0_i32_1 = arith.constant 0 : i32
    return %arg0, %c0_i32, %c0_i32_0 : i32, i32, i32
  }
  func.func @transform_2(%arg0: i32) -> (i32, i32) {
    %c0_i32 = arith.constant 0 : i32
    %c0_i32_0 = arith.constant 0 : i32
    %c0_i32_1 = arith.constant 0 : i32
    return %c0_i32, %c0_i32_0 : i32, i32
  }
  func.func @transform_3(%arg0: i32) -> (i32, i32) {
    %c0_i32 = arith.constant 0 : i32
    %c0_i32_0 = arith.constant 0 : i32
    %c0_i32_1 = arith.constant 0 : i32
    return %c0_i32, %c0_i32_0 : i32, i32
  }
  func.func @transform_4(%arg0: i32) -> (i32, i32, i32) {
    %c0_i32 = arith.constant 0 : i32
    %c0_i32_0 = arith.constant 0 : i32
    %c0_i32_1 = arith.constant 0 : i32
    %c0_i32_2 = arith.constant 0 : i32
    return %c0_i32, %c0_i32_0, %c0_i32_1 : i32, i32, i32
  }
  func.func @transform_5(%arg0: i32) -> (i32, i32) {
    %c0_i32 = arith.constant 0 : i32
    %c0_i32_0 = arith.constant 0 : i32
    %c0_i32_1 = arith.constant 0 : i32
    return %c0_i32, %c0_i32_0 : i32, i32
  }
  func.func @transform_6(%arg0: i32) -> (i32, i32) {
    %c0_i32 = arith.constant 0 : i32
    %c0_i32_0 = arith.constant 0 : i32
    %c0_i32_1 = arith.constant 0 : i32
    return %c0_i32, %c0_i32_0 : i32, i32
  }
  func.func @transform_7(%arg0: i32) -> (i32, i32, i32) {
    %c0_i32 = arith.constant 0 : i32
    %c0_i32_0 = arith.constant 0 : i32
    %c0_i32_1 = arith.constant 0 : i32
    %c0_i32_2 = arith.constant 0 : i32
    return %c0_i32, %c0_i32_0, %c0_i32_1 : i32, i32, i32
  }
  func.func @transform_8(%arg0: i32) -> (i32, i32) {
    %c0_i32 = arith.constant 0 : i32
    %c0_i32_0 = arith.constant 0 : i32
    %c0_i32_1 = arith.constant 0 : i32
    return %c0_i32, %c0_i32_0 : i32, i32
  }
  func.func @transform_9(%arg0: i32) -> (i32, i32) {
    %c0_i32 = arith.constant 0 : i32
    %c0_i32_0 = arith.constant 0 : i32
    %c0_i32_1 = arith.constant 0 : i32
    return %c0_i32, %c0_i32_0 : i32, i32
  }
  func.func @transform_10(%arg0: i32) -> (i32, i32, i32) {
    %c0_i32 = arith.constant 0 : i32
    %c0_i32_0 = arith.constant 0 : i32
    %c0_i32_1 = arith.constant 0 : i32
    return %arg0, %c0_i32, %c0_i32_0 : i32, i32, i32
  }
}

</mosaic_0001>

<bundles_post_ra>
// kernel: tpu_custom_call.1
= control target key start
LH: loop header
LB: loop body
LE: loop exit
PB: predicated region body
PF: predicated region fallthrough
CT: control target
= control target key end

     0   :  { %s2893_s0 = inlined_call_operand.hbm [shape: bf16[4,8,64], index: 0, kind: input, shape index: {}]   ;;  %s2894_s1 = inlined_call_operand.hbm [shape: bf16[4,8,256], index: 1, kind: input, shape index: {}]   ;;  %s2895_s2 = inlined_call_operand.vmem [shape: bf16[64,256], index: 2, kind: input, shape index: {}]   ;;  %s2896_s3 = inlined_call_operand.vmem [shape: f32[2,256], index: 3, kind: input, shape index: {}]   ;;  %s2897_s4 = inlined_call_operand.vmem [shape: bf16[9,8,16], index: 4, kind: input, shape index: {}]   ;;  %s2898_s5 = inlined_call_operand.vmem [shape: f32[8,1], index: 5, kind: input, shape index: {}]   ;;  %s2899_s6 = inlined_call_operand.vmem [shape: f32[8,1], index: 6, kind: input, shape index: {}]   ;;  %s2900_s7 = inlined_call_operand.vmem [shape: bf16[9,8,8], index: 7, kind: input, shape index: {}]   ;;  %s2901_s8 = inlined_call_operand.vmem [shape: f32[8,1], index: 8, kind: input, shape index: {}]   ;;  %s2902_s9 = inlined_call_operand.vmem [shape: f32[8,1], index: 9, kind: input, shape index: {}]   ;;  %s2903_s10 = inlined_call_operand.hbm [shape: f32[4,8,256], index: 10, kind: output, shape index: {}]  }
   0x1   :  { %2909 = sst [smem:[#allocation14_spill]] %s2893_s0 }
   0x2   :  { %15 = vsyncpa [#allocation3], 0 }
   0x3   :  { %17 = vsyncpa [#allocation3 + $0x1], 0 }
   0x4   :  { %18 = vsyncpa [#allocation6], 0 }
   0x5   :  { %20 = vsyncpa [#allocation6 + $0x1], 0 }
   0x6   :  { %21 = vsyncpa [#allocation4], 0 }
   0x7   :  { %23 = vsyncpa [#allocation4 + $0x1], 0  ;;  %s2345_s13 = smov 0   ;;  %s2347_s14 = smov 0  }
   0x8   :  { %s2349_s15 = smov 0   ;;  %s2351_s16 = smov 0  }
   0x9 LB: > { %2910 = sst [smem:[#allocation11_spill]] %s2272_s15  ;;  %s2366_s17 = sadd.s32 4294967295, %s2276_s16   ;;  %s2276_s16 = sphi %s2351_s16, %s2928_s16   ;;  %s2272_s15 = sphi %s2349_s15, %s2930_s15   ;;  %s2268_s14 = sphi %s2347_s14, %s2932_s14   ;;  %s2264_s13 = sphi %s2345_s13, %s2931_s13  }
   0xa   : > { %s1870_s18 = sadd.s32 4294967294, %s2276_s16   ;;  %s2370_s19 = sadd.s32 1, %s2276_s16  }
   0xb   : > { %2911 = sst [smem:[#allocation12_spill]] %s2370_s19  ;;  %s36_s20 = sadd.s32 1, %s2272_s15 }
   0xc   : > { %s33_s21 = ssub.s32 %s2276_s16, %s2370_s19  ;;  %p43_p0 = scmp.ne.s32.totalorder %s2272_s15, %s2268_s14 }
   0xd   : > { %p34_p1 = scmp.eq.s32.totalorder %s33_s21, 0  ;;  %p44_p2 = scmp.eq.s32.totalorder %s2276_s16, 0 }
   0xe   : > { %p49_p3 = scmp.ne.s32.totalorder %s2268_s14, %s2264_s13  ;;  %p50_p4 = scmp.eq.s32.totalorder %s2366_s17, 0 }
   0xf   : > { %s2382_s22 = scalar_select %p34_p1, %s2272_s15, %s36_s20  }
  0x10   : > { %p2384_p5 = por %p44_p2, %p43_p0  ;;  %p2388_p6 = por %p50_p4, %p49_p3 }
  0x11   : > { %2912 = sst [smem:[#allocation13_spill]] %s2382_s22  ;;  %p267_p7 = scmp.eq.s32.totalorder %s2366_s17, 3 }
  0x12   : > { %s2914_s24 = scalar_select %p2388_p6, 1, 0 }
  0x13   : > { %p273_p8 = scmp.eq.s32.totalorder %s1870_s18, 3  ;;  %p2029_p9 = scmp.lt.s32.totalorder %s2276_s16, 4 }
  0x14   : > { %p2394_p10 = por %p267_p7, %p43_p0  ;;  %s2403_s27 = sand.u32 1, %s2272_s15  }
  0x15   : > { %p2398_p11 = por %p273_p8, %p49_p3  ;;  %s1874_s28 = sshll.u32 %s2276_s16, 6 }
  0x16   : > { %s2915_s25 = scalar_select %p2394_p10, 1, 0 }
  0x17   : > { %s2916_s26 = scalar_select %p2398_p11, 1, 0 }
  0x18   : > { %s1873_s29 = sshll.u32 %s2403_s27, 2  ;;  %s2917_s0 = sld [smem:[#allocation14_spill]] }
  0x19   : > { %s321_s18 = scalar_lea.vmem [#allocation2], %s1873_s29  ;;  %p2414_p12 = pnand %p2029_p9, %p2384_p5 }
  0x1a   : > { %s328_s20 = sshll.u32 %s321_s18, 4  ;;  %s318_s30 = scalar_lea.sflag [#allocation3], %s2403_s27  ;;  %s2418_s20 = int_to_ptr.vmem [resolvable:$true] %s328_s20 }
  0x1b   : > { %p2148_p2 = pneg %p2414_p12 }
  0x1e   : > { %s2410_s12 = scalar_lea.hbm %s2917_s0, %s1874_s28  ;;  %s2151_s11 = scalar_lea.hbm %s2917_s0, 256 }
  0x1f   : > { %s2146_s28 = scalar_lea.hbm %s2410_s12, 64  ;;  %p2152_p5 = scmp.lt.u32.totalorder %s2410_s12, %s2917_s0 }
  0x20   : > { %p2147_p1 = scmp.ne.s32.totalorder %s2410_s12, %s2146_s28  ;;  %p2153_p7 = scmp.lt.u32.totalorder %s2151_s11, %s2146_s28 }
  0x21   : > { %p2155_p9 = scmp.lt.u32.totalorder %s2146_s28, %s2410_s12 }
  0x22   : > { %p2149_p3 = pnand %p2148_p2, %p2147_p1  ;;  %p2154_p8 = por %p2153_p7, %p2152_p5 }
  0x24   : > { %p2150_p4 = pneg %p2149_p3  ;;  %p2156_p13 = por %p2155_p9, %p2154_p8 }
  0x26   : > { %p2157_p0 = pnand %p2156_p13, %p2150_p4 }
  0x28   : > { %2160 = shalt.err (!%p2157_p0)
}
  0x29   : > { %s2161_s15 = scalar_lea.vmem %s2418_s20, 64  ;;  %s2278_s23 = smov [#allocation2]  }
  0x2a   : > { %p2162_p1 = scmp.ne.s32.totalorder %s2418_s20, %s2161_s15  ;;  %s2166_s29 = sshll.u32 %s2278_s23, 4  ;;  %s2167_s29 = int_to_ptr.vmem [resolvable:$false] %s2166_s29 }
  0x2b   : > { %s2168_s22 = scalar_lea.vmem %s2167_s29, 128  ;;  %p2169_p10 = scmp.lt.s32.totalorder %s2418_s20, %s2167_s29 }
  0x2c   : > { %p2164_p3 = pnand %p2162_p1, %p2148_p2  ;;  %p2170_p5 = scmp.lt.s32.totalorder %s2168_s22, %s2161_s15 }
  0x2e   : > { %p2165_p11 = pneg %p2164_p3  ;;  %p2171_p7 = por %p2170_p5, %p2169_p10 }
  0x30   : > { %p2172_p8 = pnand %p2171_p7, %p2165_p11 }
  0x32   : > { %2175 = shalt.err (!%p2172_p8)
}
  0x33   : > { %2021 = dma.hbm_to_vmem [thread:$0]  (!%p2414_p12), %s2410_s12, 64, %s2418_s20, %s318_s30  }
  0x34   : > { %p2919_p13 = scmp.lt.s32.totalorder %s2276_s16, 5  ;;  %p2920_p0 = scmp.ge.s32.totalorder %s2276_s16, 1 }
  0x35   : > { %s1875_s15 = sshll.u32 %s2403_s27, 3  ;;  %s1948_s11 = sshll.u32 %s2276_s16, 7 }
  0x36   : > { %p2452_p4 = pnand %p2920_p0, %p2919_p13  ;;  %s2461_s29 = scalar_lea.hbm %s2894_s1, %s1948_s11 }
  0x37   : > { %s339_s22 = scalar_lea.vmem [#allocation5], %s1875_s15  ;;  %s336_s12 = scalar_lea.sflag [#allocation6], %s2403_s27 }
  0x38   : > { %s2921_s28 = scalar_select %p2452_p4, 1, 0 }
  0x39   : > { %s347_s0 = sshll.u32 %s339_s22, 4  ;;  %s2176_s20 = scalar_lea.hbm %s2461_s29, 128  ;;  %s348_s0 = int_to_ptr.vmem [resolvable:$true] %s347_s0 }
  0x3a   : > { %p2177_p10 = scmp.ne.s32.totalorder %s2461_s29, %s2176_s20  ;;  %s2181_s18 = scalar_lea.hbm %s2894_s1, 512 }
  0x3b   : > { %p2182_p1 = scmp.lt.u32.totalorder %s2461_s29, %s2894_s1  ;;  %p2183_p3 = scmp.lt.u32.totalorder %s2181_s18, %s2176_s20 }
  0x3c   : > { %p2179_p11 = pnand %p2177_p10, %p2148_p2  ;;  %p2185_p7 = scmp.lt.u32.totalorder %s2176_s20, %s2461_s29 }
  0x3d   : > { %p2184_p5 = por %p2183_p3, %p2182_p1 }
  0x3e   : > { %p2180_p9 = pneg %p2179_p11 }
  0x3f   : > { %p2186_p8 = por %p2185_p7, %p2184_p5 }
  0x41   : > { %p2187_p13 = pnand %p2186_p8, %p2180_p9 }
  0x43   : > { %2190 = shalt.err (!%p2187_p13)
}
  0x44   : > { %s2191_s27 = scalar_lea.vmem %s348_s0, 128  ;;  %s2279_s15 = smov [#allocation5]  }
  0x45   : > { %p2192_p0 = scmp.ne.s32.totalorder %s348_s0, %s2191_s27  ;;  %s2196_s19 = sshll.u32 %s2279_s15, 4  ;;  %s2197_s19 = int_to_ptr.vmem [resolvable:$false] %s2196_s19 }
  0x46   : > { %s2198_s22 = scalar_lea.vmem %s2197_s19, 256  ;;  %p2199_p6 = scmp.lt.s32.totalorder %s348_s0, %s2197_s19 }
  0x47   : > { %p2194_p10 = pnand %p2192_p0, %p2148_p2  ;;  %p2200_p4 = scmp.lt.s32.totalorder %s2198_s22, %s2191_s27 }
  0x49   : > { %p2195_p11 = pneg %p2194_p10  ;;  %p2201_p1 = por %p2200_p4, %p2199_p6 }
  0x4b   : > { %p2202_p3 = pnand %p2201_p1, %p2195_p11 }
  0x4d   : > { %2205 = shalt.err (!%p2202_p3)
}
  0x4e   : > { %2024 = dma.hbm_to_vmem [thread:$0]  (!%p2414_p12), %s2461_s29, 128, %s348_s0, %s336_s12  }
  0x4f   : > { %p2922_p9 = scmp.ne.s32.totalorder %s2921_s28, 0 }
  0x50   : > { %s2486_s20 = sand.u32 (!%p2922_p9), 1, %s2268_s14   ;;  %p2923_p6 = scmp.ne.s32.totalorder (!%p2922_p9), %s2914_s24, 0 }
  0x51   : > { %356 = sbr.rel (%p2922_p9) target bundleno = 1208 (0x4b8), region = 60  ;;  %s1879_s30 = sshll.u32 (!%p2922_p9), %s2486_s20, 2 }
  0x52   : > { %s359_s18 = scalar_lea.sflag (!%p2922_p9), [#allocation3], %s2486_s20  ;;  %s2490_s11 = scalar_lea.vmem (!%p2922_p9), [#allocation2], %s1879_s30 }
  0x58   : > { %2251 = dma.done.wait (%p2923_p6), %s359_s18, 64  }
  0x59   : > { %2253 = vsyncadd (%p2923_p6), %s359_s18, 4294967232  ;;  %s1880_s0 = sshll.u32 %s2486_s20, 3  ;;  %s368_s21 = scalar_lea.sflag [#allocation6], %s2486_s20 }
  0x5a   : > { %s371_s28 = scalar_lea.vmem [#allocation5], %s1880_s0 }
  0x5b   : > { %2255 = dma.done.wait (%p2923_p6), %s368_s21, 128  }
  0x5c   : > { %2257 = vsyncadd (%p2923_p6), %s368_s21, 4294967168  ;;  %v2280_v0 = vmov 0   ;;  %v2134_v1 = vld [vmem:[%s2895_s2 + $0x4] ss:$8 sps:$4 sm:$0xff]   ;;  %v2136_v2 = vld [vmem:[%s2895_s2] ss:$8 sps:$4 sm:$0xff]   ;;  %v536_v22 = vlaneseq }
  0x5d   : > { %502 = vmatprep.mubr.bf16.mxu0 %v2280_v0  ;;  %609 = vmatprep.mubr.bf16.mxu1 %v2280_v0  ;;  %v2137_v3 = vld [vmem:[%s2895_s2 + $0x14] ss:$8 sps:$4 sm:$0xff]   ;;  %v2139_v4 = vld [vmem:[%s2895_s2 + $0x10] ss:$8 sps:$4 sm:$0xff]   ;;  %v2140_v5 = vld [vmem:[%s2895_s2 + $0x24] ss:$8 sps:$4 sm:$0xff]  }
  0x5e   : > { %2122 = vset.pattern.permute.xlu0 %v2280_v0  ;;  %2123 = vset.pattern.permute.xlu1 %v2280_v0  ;;  %v511_v6 = vld [vmem:[%s371_s28] sm:$0xff]  ;;  %s2281_s23 = smov 17   ;;  %s2282_s28 = smov 16   ;;  %v417_v13 = vld [vmem:[%s2490_s11] sm:$0xf]  ;;  %vm466_vm0 = vcmask 523264  }
  0x5f   : > { %470 = vmatprep.subr.bf16.mxu0 %v2134_v1  ;;  %v2521_v7 = vunpack.c.l.bf16 %v511_v6  ;;  %v2523_v8 = vunpack.c.h.bf16 %v511_v6  ;;  %v2142_v9 = vld [vmem:[%s2895_s2 + $0x20] ss:$8 sps:$4 sm:$0xff]   ;;  %v2143_v10 = vld [vmem:[%s2895_s2 + $0x34] ss:$8 sps:$4 sm:$0xff]   ;;  %v2145_v12 = vld [vmem:[%s2895_s2 + $0x30] ss:$8 sps:$4 sm:$0xff]  }
  0x60   : > { %471 = vmatpush1.bf16.msra.mxu0 %v2136_v2  ;;  %s2283_s15 = smov 15   ;;  %s2284_s11 = smov 1   ;;  %v1145_v20 = vld [vmem:[%s2898_s5] sm:$0xff]  ;;  %v537_v24 = vshrl.u32 %v536_v22, 7  ;;  %vm526_vm1 = vcmask 138240   ;;  %vm561_vm2 = vcmask 130048  }
  0x61   : > { %472 = vmatprep.subr.bf16.mxu0 %v2137_v3  ;;  %v2082_v11 = vpack.i.bf16 %v2523_v8, %v2521_v7  ;;  %v2097_v19 = vpack.i.bf16 %v2521_v7, %v2523_v8  ;;  %s2285_s19 = smov 127   ;;  %s2286_s22 = smov 113   ;;  %v1153_v21 = vld [vmem:[%s2899_s6] sm:$0xff]  ;;  %vm2599_vm3 = vmneg %vm561_vm2  ;;  %vm670_vm4 = vcmask 121856   ;;  %vm752_vm6 = vcmask 7168  }
  0x62   : > { %s2287_s30 = smov 112   ;;  %s2288_s18 = smov 111   ;;  %v538_v26 = vsub.s32 0, %v537_v24  ;;  %v542_v27 = vsub.s32 1, %v537_v24  ;;  %vm1895_vm5 = vmpackc.low %vm2599_vm3, %vm2599_vm3  ;;  %v1892_v59 = vld [vmem:[%s2897_s4 + $0x4] sm:$0xf] }
  0x63   : > { %2083 = vrot.lane.b32.xlu1 %v2082_v11, %s2281_s23  ;;  %2073 = vrot.lane.b32.xlu0 %v2082_v11, %s2282_s28  ;;  %v414_v30 = vld [vmem:[%s2896_s3] ss:$2 sm:$0x3]  ;;  %v1882_v42 = vld [vmem:[%s2896_s3 + $0x1] ss:$2 sm:$0x3] }
  0x64   : > { %473 = vmatpush1.bf16.msra.mxu0 %v2139_v4  ;;  %v2589_v34 = vrot.slane %v414_v30, %v538_v26  ;;  %v2591_v36 = vrot.slane %v414_v30, %v542_v27  ;;  %v2610_v52 = vrot.slane %v1882_v42, %v542_v27  ;;  %v2625_v6 = vrot.slane %v1882_v42, %v538_v26  ;;  %v1900_v30 = vld [vmem:[%s2897_s4 + $0x8] sm:$0xf]  ;;  %v1902_v42 = vld [vmem:[%s2897_s4 + $0xc] sm:$0xf]  ;;  %s1881_s29 = sshll.u32 %s2486_s20, 4  ;;  %s1949_s12 = sshll.u32 %s2366_s17, 8 }
  0x65   : > { %474 = vmatprep.subr.bf16.mxu0 %v2140_v5  ;;  %vm873_vm7 = vcmask 1039360   ;;  %vm944_vm8 = vcmask 924672   ;;  %vm1015_vm9 = vcmask 916480   ;;  %vm1082_vm11 = vcmask 908288   ;;  %s412_s27 = scalar_lea.vmem [#allocation7], %s1881_s29  ;;  %p2926_p2 = scmp.ne.s32.totalorder %s2915_s25, 0 }
  0x66   : > { %vm1911_vm10 = vmpackc.low %vm1015_vm9, %vm1015_vm9  ;;  %vm1194_vm12 = vcmask 1043456   ;;  %vm1190_vm13 = vcmask 64512   ;;  %s1777_s24 = sshll.u32 %s412_s27, 4  ;;  %s2289_s17 = smov [#allocation7]   ;;  %s2852_s24 = int_to_ptr.vmem [resolvable:$true] %s1777_s24 }
  0x68   : > { %475 = vmatpush1.bf16.msra.mxu0 %v2142_v9 }
  0x69   : > { %476 = vmatprep.subr.bf16.mxu0 %v2143_v10 }
  0x6c   : > { %477 = vmatpush1.bf16.msra.mxu0 %v2145_v12 }
  0x6f   : > { %1891 = vmatmul.mubr.msk.bf16.vlgmr.msra.gmra.mrb[0].mxu0 %vm466_vm0, %v417_v13 }
  0x70   : > { %1283 = vmatprep.mubr.bf16.mxu0 %v2280_v0 }
  0xd5   : > { %v2084_v23 = vpop.permute.xlu1 %2083  ;;  %v2074_v25 = vpop.permute.xlu0 %2073 }
  0xd6   : > { %v2086_v28 = vunpack.i.h.bf16 %v2084_v23  ;;  %v2085_v29 = vunpack.i.l.bf16 %v2084_v23  ;;  %v2076_v32 = vunpack.i.h.bf16 %v2074_v25  ;;  %v2075_v33 = vunpack.i.l.bf16 %v2074_v25  ;;  %v550_v23 = vld [vmem:[%s2897_s4] sm:$0xf] }
  0xd8   : > { %v527_v37 = vsel %vm526_vm1, %v2085_v29, %v2086_v28  ;;  %v533_v38 = vsel %vm526_vm1, 0.0, %v2085_v29  ;;  %v562_v47 = vsel %vm561_vm2, %v2075_v33, %v2076_v32 }
  0xd9   : > { %v546_v49 = vmul.f32 %v2589_v34, %v533_v38  ;;  %v547_v53 = vmul.f32 %v2591_v36, %v527_v37 }
 0x142   : > { %v2540_v14 = vpop.f32.mrb[0].mxu0 }
 0x143   : > { %522 = vrot.lane.b32.xlu1 %v2540_v14, %s2281_s23  ;;  %v2544_v15 = vpop.f32.mrb[1].mxu0  ;;  %v817_v43 = vpack.c.bf16 %v2540_v14, %v2521_v7 }
 0x144   : > { %v508_v16 = vpop.f32.mrb[2].mxu0  ;;  %v2077_v17 = vpack.i.bf16 %v2544_v15, %v2540_v14 }
 0x145   : > { %v509_v18 = vpop.f32.mrb[3].mxu0 }
 0x146   : > { %2078 = vrot.lane.b32.xlu0 %v2077_v17, %s2282_s28 }
 0x147   : > { %2088 = vrot.lane.b32.xlu1 %v2082_v11, %s2283_s15 }
 0x14a   : > { %524 = vrot.lane.b32.xlu0 %v2544_v15, %s2281_s23 }
 0x14b   : > { %668 = vrot.lane.b32.xlu1 %v2544_v15, %s2283_s15 }
 0x14e   : > { %666 = vrot.lane.b32.xlu0 %v2540_v14, %s2283_s15 }
 0x14f   : > { %748 = vrot.lane.b32.xlu1 %v2540_v14, %s2284_s11 }
 0x152   : > { %2093 = vrot.lane.b32.xlu0 %v2082_v11, %s2284_s11 }
 0x153   : > { %2098 = vrot.lane.b32.xlu1 %v2097_v19, %s2285_s19 }
 0x156   : > { %750 = vrot.lane.b32.xlu0 %v2544_v15, %s2284_s11 }
 0x157   : > { %869 = vrot.lane.b32.xlu1 %v2540_v14, %s2285_s19 }
 0x15a   : > { %871 = vrot.lane.b32.xlu0 %v2544_v15, %s2285_s19 }
 0x15b   : > { %942 = vrot.lane.b32.xlu1 %v2544_v15, %s2286_s22 }
 0x15e   : > { %2103 = vrot.lane.b32.xlu0 %v2097_v19, %s2286_s22 }
 0x15f   : > { %2108 = vrot.lane.b32.xlu1 %v2082_v11, %s2287_s30 }
 0x162   : > { %940 = vrot.lane.b32.xlu0 %v2540_v14, %s2286_s22 }
 0x163   : > { %2118 = vrot.lane.b32.xlu1 %v2097_v19, %s2288_s18 }
 0x166   : > { %2113 = vrot.lane.b32.xlu0 %v2077_v17, %s2287_s30 }
 0x167   : > { %1078 = vrot.lane.b32.xlu1 %v2540_v14, %s2288_s18 }
 0x16a   : > { %1080 = vrot.lane.b32.xlu0 %v2544_v15, %s2288_s18 }
 0x16b   : > { %1156 = vperm.xlu1 %2123, %v1153_v21  }
 0x16e   : > { %1148 = vperm.xlu0 %2122, %v1145_v20  }
 0x1b5   : > { %v523_v31 = vpop.permute.xlu1 %522 }
 0x1b6   : > { %v534_v44 = vsel %vm526_vm1, 0.0, %v523_v31 }
 0x1b7   : > { %v548_v54 = vmul.f32 %v2589_v34, %v534_v44 }
 0x1b8   : > { %v2079_v35 = vpop.permute.xlu0 %2078 }
 0x1b9   : > { %v2081_v39 = vunpack.i.h.bf16 %v2079_v35  ;;  %v2080_v40 = vunpack.i.l.bf16 %v2079_v35  ;;  %v2089_v41 = vpop.permute.xlu1 %2088  ;;  %v551_v1 = vpack.c.bf16 %v548_v54, %v546_v49  ;;  %v1904_v54 = vld [vmem:[%s2897_s4 + $0x10] sm:$0xf] }
 0x1ba   : > { %v2091_v45 = vunpack.i.h.bf16 %v2089_v41  ;;  %v2090_v46 = vunpack.i.l.bf16 %v2089_v41 }
 0x1bb   : > { %v563_v48 = vsel %vm561_vm2, %v2080_v40, %v2081_v39  ;;  %v1896_v55 = vpack.c.bf16 %v2080_v40, %v2075_v33  ;;  %v818_v33 = vpack.c.bf16 %v2544_v15, %v2523_v8 }
 0x1bc   : > { %v525_v50 = vpop.permute.xlu0 %524  ;;  %v573_v51 = vpack.c.bf16 %v563_v48, %v562_v47  ;;  %v671_v56 = vsel %vm670_vm4, %v2090_v46, %v2091_v45  ;;  %v677_v11 = vsel %vm670_vm4, 0.0, %v2090_v46 }
 0x1bd   : > { %v528_v57 = vsel %vm526_vm1, %v523_v31, %v525_v50  ;;  %v669_v60 = vpop.permute.xlu1 %668  ;;  %v691_v63 = vmul.f32 %v2610_v52, %v671_v56  ;;  %v690_v19 = vmul.f32 %v2625_v6, %v677_v11 }
 0x1be   : > { %v549_v58 = vmul.f32 %v2591_v36, %v528_v57  ;;  %577 = vmatprep.subr.bf16.mxu1 %v573_v51 }
 0x1bf   : > { %1897 = vmatpush1.bf16.msk.msra.mxu1 %vm1895_vm5, %v1896_v55 }
 0x1c0   : > { %v667_v61 = vpop.permute.xlu0 %666  ;;  %v552_v62 = vpack.c.bf16 %v549_v58, %v547_v53 }
 0x1c1   : > { %v672_v2 = vsel %vm670_vm4, %v667_v61, %v669_v60  ;;  %v678_v12 = vsel %vm670_vm4, 0.0, %v667_v61  ;;  %v749_v16 = vpop.permute.xlu1 %748 }
 0x1c2   : > { %v693_v3 = vmul.f32 %v2610_v52, %v672_v2  ;;  %1898 = vmatmul.mubr.msk.bf16.vlgmr.msra.gmra.mrb[0].mxu1 %vm561_vm2, %v1892_v59  ;;  %621 = vmatprep.subr.bf16.mxu1 %v552_v62  ;;  %v692_v20 = vmul.f32 %v2625_v6, %v678_v12  ;;  %v760_v27 = vsel %vm752_vm6, 0.0, %v749_v16 }
 0x1c3   : > { %622 = vmatpush1.bf16.msra.mxu1 %v551_v1  ;;  %653 = vmatprep.mubr.bf16.mxu1 %v2280_v0  ;;  %v763_v29 = vmul.f32 %v760_v27, %v2589_v34 }
 0x1c4   : > { %v2094_v4 = vpop.permute.xlu0 %2093  ;;  %v697_v5 = vpack.c.bf16 %v693_v3, %v691_v63  ;;  %v696_v25 = vpack.c.bf16 %v692_v20, %v690_v19 }
 0x1c5   : > { %v2096_v9 = vunpack.i.h.bf16 %v2094_v4  ;;  %v2095_v10 = vunpack.i.l.bf16 %v2094_v4  ;;  %v2099_v32 = vpop.permute.xlu1 %2098 }
 0x1c6   : > { %701 = vmatprep.subr.bf16.mxu1 %v697_v5  ;;  %v2100_v35 = vunpack.i.l.bf16 %v2099_v32  ;;  %v2101_v44 = vunpack.i.h.bf16 %v2099_v32  ;;  %v1906_v5 = vld [vmem:[%s2897_s4 + $0x14] sm:$0xf] }
 0x1c7   : > { %v753_v13 = vsel %vm752_vm6, %v2095_v10, %v2096_v9  ;;  %v759_v26 = vsel %vm752_vm6, 0.0, %v2095_v10 }
 0x1c8   : > { %v751_v17 = vpop.permute.xlu0 %750  ;;  %v762_v18 = vmul.f32 %v753_v13, %v2591_v36  ;;  %v761_v28 = vmul.f32 %v759_v26, %v2589_v34  ;;  %v880_v38 = vsel %vm873_vm7, %v2100_v35, 0.0  ;;  %v874_v47 = vsel %vm873_vm7, %v2101_v44, %v2100_v35 }
 0x1c9   : > { %v754_v21 = vsel %vm752_vm6, %v749_v16, %v751_v17  ;;  %v883_v40 = vmul.f32 %v880_v38, %v2610_v52  ;;  %v870_v8 = vpop.permute.xlu1 %869  ;;  %v882_v51 = vmul.f32 %v874_v47, %v2625_v6 }
 0x1ca   : > { %v764_v22 = vmul.f32 %v754_v21, %v2591_v36  ;;  %v767_v31 = vpack.c.bf16 %v763_v29, %v761_v28 }
 0x1cc   : > { %v768_v24 = vpack.c.bf16 %v764_v22, %v762_v18  ;;  %v872_v37 = vpop.permute.xlu0 %871 }
 0x1cd   : > { %v881_v39 = vsel %vm873_vm7, %v872_v37, 0.0  ;;  %v875_v48 = vsel %vm873_vm7, %v870_v8, %v872_v37  ;;  %v943_v49 = vpop.permute.xlu1 %942  ;;  %v1915_v37 = vld [vmem:[%s2897_s4 + $0x20] sm:$0xf] }
 0x1ce   : > { %1899 = vmatmul.mubr.msk.bf16.vlgmr.msra.gmra.mrb[0].mxu1 %vm561_vm2, %v550_v23  ;;  %v885_v41 = vmul.f32 %v881_v39, %v2610_v52  ;;  %v884_v7 = vmul.f32 %v875_v48, %v2625_v6  ;;  %v952_v14 = vsel %vm944_vm8, %v943_v49, 0.0 }
 0x1cf   : > { %702 = vmatpush1.bf16.msra.mxu1 %v696_v25  ;;  %733 = vmatprep.mubr.bf16.mxu1 %v2280_v0  ;;  %v956_v55 = vmul.f32 %v952_v14, %v2591_v36 }
 0x1d0   : > { %772 = vmatprep.subr.bf16.mxu1 %v768_v24  ;;  %v2104_v15 = vpop.permute.xlu0 %2103  ;;  %v889_v45 = vpack.c.bf16 %v885_v41, %v883_v40  ;;  %v888_v56 = vpack.c.bf16 %v884_v7, %v882_v51  ;;  %v1908_v24 = vld [vmem:[%s2897_s4 + $0x18] sm:$0xf] }
 0x1d1   : > { %v2105_v46 = vunpack.i.l.bf16 %v2104_v15  ;;  %v2106_v58 = vunpack.i.h.bf16 %v2104_v15  ;;  %v2109_v63 = vpop.permute.xlu1 %2108 }
 0x1d2   : > { %v2111_v3 = vunpack.i.h.bf16 %v2109_v63  ;;  %v2110_v16 = vunpack.i.l.bf16 %v2109_v63 }
 0x1d3   : > { %v951_v50 = vsel %vm944_vm8, %v2105_v46, 0.0  ;;  %v945_v60 = vsel %vm944_vm8, %v2106_v58, %v2105_v46 }
 0x1d4   : > { %v954_v53 = vmul.f32 %v951_v50, %v2591_v36  ;;  %v941_v57 = vpop.permute.xlu0 %940  ;;  %v953_v1 = vmul.f32 %v945_v60, %v2589_v34  ;;  %v1016_v20 = vsel %vm1015_vm9, %v2110_v16, %v2111_v3  ;;  %v1750_v50 = vld [vmem:[%s2902_s9] sm:$0xff] }
 0x1d5   : > { %v946_v61 = vsel %vm944_vm8, %v941_v57, %v943_v49  ;;  %v2119_v10 = vpop.permute.xlu1 %2118  ;;  %v1742_v49 = vld [vmem:[%s2901_s8] sm:$0xff] }
 0x1d6   : > { %v960_v59 = vpack.c.bf16 %v956_v55, %v954_v53  ;;  %v955_v2 = vmul.f32 %v946_v61, %v2589_v34  ;;  %v2120_v12 = vunpack.i.l.bf16 %v2119_v10  ;;  %v2121_v26 = vunpack.i.h.bf16 %v2119_v10 }
 0x1d8   : > { %v2114_v62 = vpop.permute.xlu0 %2113  ;;  %v959_v9 = vpack.c.bf16 %v955_v2, %v953_v1  ;;  %v1089_v18 = vsel %vm1082_vm11, %v2120_v12, 0.0  ;;  %v1083_v29 = vsel %vm1082_vm11, %v2121_v26, %v2120_v12 }
 0x1d9   : > { %v2116_v4 = vunpack.i.h.bf16 %v2114_v62  ;;  %v2115_v17 = vunpack.i.l.bf16 %v2114_v62  ;;  %v1092_v21 = vmul.f32 %v1089_v18, %v2610_v52  ;;  %v1079_v28 = vpop.permute.xlu1 %1078 }
 0x1da   : > { %1901 = vmatmul.mubr.msk.bf16.vlgmr.msra.gmra.mrb[0].mxu1 %vm561_vm2, %v1900_v30 }
 0x1db   : > { %773 = vmatpush1.bf16.msra.mxu1 %v767_v31  ;;  %804 = vmatprep.mubr.bf16.mxu1 %v2280_v0  ;;  %v1912_v11 = vpack.c.bf16 %v2116_v4, %v2111_v3  ;;  %v1017_v22 = vsel %vm1015_vm9, %v2115_v17, %v2116_v4  ;;  %v1091_v31 = vmul.f32 %v1083_v29, %v2625_v6  ;;  %v1175_v4 = vld [vmem:[%s2900_s7] sm:$0xf] }
 0x1dc   : > { %822 = vmatprep.subr.bf16.mxu1 %v818_v33  ;;  %v1081_v13 = vpop.permute.xlu0 %1080  ;;  %v1026_v25 = vpack.c.bf16 %v1017_v22, %v1016_v20  ;;  %v1910_v33 = vld [vmem:[%s2897_s4 + $0x1c] sm:$0xf] }
 0x1dd   : > { %v1090_v19 = vsel %vm1082_vm11, %v1081_v13, 0.0  ;;  %v1084_v30 = vsel %vm1082_vm11, %v1079_v28, %v1081_v13 }
 0x1de   : > { %v1094_v23 = vmul.f32 %v1090_v19, %v2610_v52  ;;  %v1093_v32 = vmul.f32 %v1084_v30, %v2625_v6 }
 0x1e0   : > { %v1098_v27 = vpack.c.bf16 %v1094_v23, %v1092_v21  ;;  %v1097_v35 = vpack.c.bf16 %v1093_v32, %v1091_v31  ;;  %v1922_v21 = vld [vmem:[%s2900_s7 + $0x8] sm:$0xf] }
 0x1e6   : > { %1903 = vmatmul.mubr.msk.bf16.vlgmr.msra.gmra.mrb[0].mxu1 %vm561_vm2, %v1902_v42 }
 0x1e7   : > { %823 = vmatpush1.bf16.msra.mxu1 %v817_v43  ;;  %854 = vmatprep.mubr.bf16.mxu1 %v2280_v0 }
 0x1e8   : > { %893 = vmatprep.subr.bf16.mxu1 %v889_v45 }
 0x1ea   : > { %v1157_v40 = vpop.permute.xlu1 %1156 }
 0x1ed   : > { %v1149_v38 = vpop.permute.xlu0 %1148 }
 0x1f2   : > { %1905 = vmatmul.mubr.msk.bf16.vlgmr.msra.gmra.mrb[0].mxu1 %vm561_vm2, %v1904_v54 }
 0x1f3   : > { %894 = vmatpush1.bf16.msra.mxu1 %v888_v56  ;;  %925 = vmatprep.mubr.bf16.mxu1 %v2280_v0 }
 0x1f4   : > { %964 = vmatprep.subr.bf16.mxu1 %v960_v59 }
 0x1fe   : > { %1907 = vmatmul.mubr.msk.bf16.vlgmr.msra.gmra.mrb[0].mxu1 %vm561_vm2, %v1906_v5 }
 0x1ff   : > { %965 = vmatpush1.bf16.msra.mxu1 %v959_v9  ;;  %996 = vmatprep.mubr.bf16.mxu1 %v2280_v0 }
 0x200   : > { %1913 = vmatprep.subr.msk.bf16.mxu1 %vm1911_vm10, %v1912_v11 }
 0x20a   : > { %1909 = vmatmul.mubr.msk.bf16.vlgmr.msra.gmra.mrb[0].mxu1 %vm561_vm2, %v1908_v24 }
 0x20b   : > { %1032 = vmatpush1.bf16.msra.mxu1 %v1026_v25  ;;  %1063 = vmatprep.mubr.bf16.mxu1 %v2280_v0 }
 0x20c   : > { %1102 = vmatprep.subr.bf16.mxu1 %v1098_v27 }
 0x216   : > { %1914 = vmatmul.mubr.msk.bf16.vlgmr.msra.gmra.mrb[0].mxu1 %vm561_vm2, %v1910_v33 }
 0x217   : > { %1103 = vmatpush1.bf16.msra.mxu1 %v1097_v35  ;;  %1134 = vmatprep.mubr.bf16.mxu1 %v2280_v0 }
 0x222   : > { %1916 = vmatmul.mubr.msk.bf16.vlgmr.msra.gmra.mrb[0].mxu1 %vm561_vm2, %v1915_v37 }
 0x223   : > { %1233 = vmatprep.mubr.bf16.mxu1 %v2280_v0 }
 0x2f5   : > { %v1136_v39 = vpop.f32.mrb[0].mxu1 }
 0x2f6   : > { %v1151_v41 = vmul.f32 %v1149_v38, %v1136_v39  ;;  %v1138_v42 = vpop.f32.mrb[1].mxu1  ;;  %v1917_v39 = vld [vmem:[%s2900_s7 + $0x4] sm:$0xf] }
 0x2f7   : > { %v1152_v8 = vmul.f32 %v1149_v38, %v1138_v42  ;;  %v1140_v15 = vpop.f32.mrb[2].mxu1  ;;  %v1925_v38 = vld [vmem:[%s2900_s7 + $0xc] sm:$0xf] }
 0x2f8   : > { %v1159_v43 = vadd.f32 %v1157_v40, %v1151_v41  ;;  %v1141_v44 = vpop.f32.mrb[3].mxu1 }
 0x2f9   : > { %v1160_v45 = vadd.f32 %v1157_v40, %v1152_v8 }
 0x2fa   : > { %v2711_v46 = vmax.f32 %v1159_v43, 0.0 }
 0x2fb   : > { %v2713_v47 = vmax.f32 %v1160_v45, 0.0 }
 0x2fc   : > { %1165 = vrot.lane.b32.xlu1 %v2711_v46, %s2281_s23  ;;  %v1426_v37 = vpack.c.bf16 %v2711_v46, %v2711_v46 }
 0x2fd   : > { %1167 = vrot.lane.b32.xlu0 %v2713_v47, %s2281_s23  ;;  %v2124_v48 = vpack.i.bf16 %v2713_v47, %v2711_v46  ;;  %v1427_v24 = vpack.c.bf16 %v2713_v47, %v2713_v47  ;;  %s2850_s23 = scalar_lea.hbm %s2903_s10, %s1949_s12 }
 0x2fe   : > { %v1432_v42 = vsel %vm1194_vm12, %v1426_v37, 0 }
 0x300   : > { %1292 = vrot.lane.b32.xlu1 %v2711_v46, %s2283_s15 }
 0x301   : > { %1294 = vrot.lane.b32.xlu0 %v2713_v47, %s2283_s15  ;;  %s1763_s15 = scalar_lea.sflag [#allocation4], %s2486_s20 }
 0x304   : > { %1358 = vrot.lane.b32.xlu1 %v2711_v46, %s2284_s11 }
 0x305   : > { %1360 = vrot.lane.b32.xlu0 %v2713_v47, %s2284_s11  ;;  %s2206_s11 = scalar_lea.vmem %s2852_s24, 256 }
 0x306   : > { %p2207_p12 = scmp.ne.s32.totalorder %s2852_s24, %s2206_s11 }
 0x308   : > { %1480 = vrot.lane.b32.xlu1 %v2711_v46, %s2285_s19  ;;  %p2208_p4 = pnand %p2207_p12, %p2926_p2 }
 0x309   : > { %1482 = vrot.lane.b32.xlu0 %v2713_v47, %s2285_s19  ;;  %s2210_s19 = sshll.u32 %s2289_s17, 4  ;;  %s2211_s19 = int_to_ptr.vmem [resolvable:$false] %s2210_s19 }
 0x30a   : > { %p2209_p5 = pneg %p2208_p4  ;;  %p2213_p7 = scmp.lt.s32.totalorder %s2852_s24, %s2211_s19 }
 0x30c   : > { %1546 = vrot.lane.b32.xlu1 %v2711_v46, %s2286_s22 }
 0x30d   : > { %1548 = vrot.lane.b32.xlu0 %v2713_v47, %s2286_s22 }
 0x310   : > { %2125 = vrot.lane.b32.xlu1 %v2124_v48, %s2287_s30 }
 0x311   : > { %1676 = vrot.lane.b32.xlu0 %v2711_v46, %s2288_s18 }
 0x314   : > { %1678 = vrot.lane.b32.xlu1 %v2713_v47, %s2288_s18  ;;  %v1928_v47 = vld [vmem:[%s2900_s7 + $0x10] sm:$0xf] }
 0x315   : > { %2130 = vrot.lane.b32.xlu0 %v2124_v48, %s2282_s28  ;;  %s2212_s28 = scalar_lea.vmem %s2211_s19, 512 }
 0x316   : > { %p2214_p8 = scmp.lt.s32.totalorder %s2212_s28, %s2206_s11 }
 0x318   : > { %1745 = vperm.xlu1 %2123, %v1742_v49   ;;  %p2215_p13 = por %p2214_p8, %p2213_p7 }
 0x319   : > { %1753 = vperm.xlu0 %2122, %v1750_v50  }
 0x31a   : > { %p2216_p0 = pnand %p2215_p13, %p2209_p5 }
 0x36e   : > { %v1166_v51 = vpop.permute.xlu1 %1165 }
 0x36f   : > { %v1172_v7 = vsel %vm526_vm1, 0.0, %v1166_v51  ;;  %v1168_v14 = vpop.permute.xlu0 %1167 }
 0x370   : > { %v1173_v53 = vmul.f32 %v1172_v7, %v2589_v34  ;;  %v1169_v54 = vsel %vm526_vm1, %v1166_v51, %v1168_v14 }
 0x371   : > { %v1174_v55 = vmul.f32 %v1169_v54, %v2591_v36  ;;  %v1931_v54 = vld [vmem:[%s2900_s7 + $0x14] sm:$0xf] }
 0x372   : > { %v1176_v56 = vpack.c.bf16 %v1173_v53, %v1173_v53  ;;  %v1293_v57 = vpop.permute.xlu1 %1292 }
 0x373   : > { %v1177_v58 = vpack.c.bf16 %v1174_v55, %v1174_v55  ;;  %v1299_v59 = vsel %vm670_vm4, 0.0, %v1293_v57  ;;  %v1295_v60 = vpop.permute.xlu0 %1294 }
 0x374   : > { %v1300_v61 = vmul.f32 %v1299_v59, %v2625_v6  ;;  %v1296_v62 = vsel %vm670_vm4, %v1293_v57, %v1295_v60  ;;  %v1246_v63 = vsel %vm1194_vm12, %v1176_v56, 0 }
 0x375   : > { %v1301_v1 = vmul.f32 %v1296_v62, %v2610_v52  ;;  %1920 = vmatprep.subr.msk.bf16.mxu0 %vm1194_vm12, %v1177_v58  ;;  %v1934_v62 = vld [vmem:[%s2900_s7 + $0x18] sm:$0xf] }
 0x376   : > { %v1304_v2 = vpack.c.bf16 %v1300_v61, %v1300_v61  ;;  %v1359_v3 = vpop.permute.xlu1 %1358  ;;  %1252 = vmatpush1.bf16.msra.mxu0 %v1246_v63 }
 0x377   : > { %v1305_v5 = vpack.c.bf16 %v1301_v1, %v1301_v1  ;;  %v1361_v9 = vpop.permute.xlu0 %1360  ;;  %v1365_v13 = vsel %vm752_vm6, 0.0, %v1359_v3 }
 0x378   : > { %v1362_v10 = vsel %vm752_vm6, %v1359_v3, %v1361_v9  ;;  %v1310_v11 = vsel %vm1194_vm12, %v1304_v2, 0  ;;  %v1366_v18 = vmul.f32 %v1365_v13, %v2589_v34  ;;  %v1940_v9 = vld [vmem:[%s2900_s7 + $0x20] sm:$0xf] }
 0x379   : > { %v1367_v12 = vmul.f32 %v1362_v10, %v2591_v36  ;;  %1921 = vmatmul.mubr.msk.bf16.vlgmr.msra.gmra.mrb[4].mxu0 %vm1190_vm13, %v1175_v4  ;;  %1923 = vmatprep.subr.msk.bf16.mxu0 %vm1194_vm12, %v1305_v5  ;;  %v1937_v4 = vld [vmem:[%s2900_s7 + $0x1c] sm:$0xf] }
 0x37a   : > { %1316 = vmatpush1.bf16.msra.mxu0 %v1310_v11  ;;  %1347 = vmatprep.mubr.bf16.mxu0 %v2280_v0  ;;  %v1370_v20 = vpack.c.bf16 %v1366_v18, %v1366_v18  ;;  %v1481_v40 = vpop.permute.xlu1 %1480 }
 0x37b   : > { %v1371_v16 = vpack.c.bf16 %v1367_v12, %v1367_v12  ;;  %v1483_v17 = vpop.permute.xlu0 %1482 }
 0x37c   : > { %v1376_v23 = vsel %vm1194_vm12, %v1370_v20, 0  ;;  %v1487_v28 = vsel %vm873_vm7, %v1483_v17, 0.0  ;;  %v1484_v8 = vsel %vm873_vm7, %v1481_v40, %v1483_v17 }
 0x37d   : > { %1926 = vmatprep.subr.msk.bf16.mxu0 %vm1194_vm12, %v1371_v16  ;;  %v1489_v33 = vmul.f32 %v1487_v28, %v2610_v52  ;;  %v1488_v15 = vmul.f32 %v1484_v8, %v2625_v6 }
 0x37e   : > { %v1547_v45 = vpop.permute.xlu1 %1546 }
 0x37f   : > { %v1549_v19 = vpop.permute.xlu0 %1548  ;;  %v1493_v41 = vpack.c.bf16 %v1489_v33, %v1489_v33  ;;  %v1492_v44 = vpack.c.bf16 %v1488_v15, %v1488_v15 }
 0x380   : > { %v1553_v43 = vsel %vm944_vm8, %v1549_v19, 0.0  ;;  %v1550_v50 = vsel %vm944_vm8, %v1547_v45, %v1549_v19 }
 0x381   : > { %v1555_v46 = vmul.f32 %v1553_v43, %v2591_v36  ;;  %v1498_v49 = vsel %vm1194_vm12, %v1492_v44, 0  ;;  %v1554_v7 = vmul.f32 %v1550_v50, %v2589_v34 }
 0x382   : > { %v2126_v51 = vpop.permute.xlu1 %2125 }
 0x383   : > { %v2774_v22 = vpop.permute.xlu0 %1676  ;;  %v1559_v48 = vpack.c.bf16 %v1555_v46, %v1555_v46  ;;  %v2128_v36 = vunpack.i.h.bf16 %v2126_v51  ;;  %v1558_v14 = vpack.c.bf16 %v1554_v7, %v1554_v7  ;;  %v2127_v57 = vunpack.i.l.bf16 %v2126_v51 }
 0x385   : > { %1924 = vmatmul.mubr.msk.bf16.vlgmr.msra.gmra.mrb[4].mxu0 %vm1190_vm13, %v1922_v21  ;;  %v1619_v53 = vsel %vm1015_vm9, %v2128_v36, 0.0  ;;  %v1564_v56 = vsel %vm1194_vm12, %v1558_v14, 0  ;;  %v1616_v59 = vsel %vm1015_vm9, %v2127_v57, %v2128_v36 }
 0x386   : > { %1382 = vmatpush1.bf16.msra.mxu0 %v1376_v23  ;;  %1413 = vmatprep.mubr.bf16.mxu0 %v2280_v0  ;;  %v1623_v55 = vpack.c.bf16 %v1619_v53, %v1619_v53  ;;  %v1679_v58 = vpop.permute.xlu1 %1678  ;;  %v1622_v61 = vpack.c.bf16 %v1616_v59, %v1616_v59 }
 0x387   : > { %1929 = vmatprep.subr.msk.bf16.mxu0 %vm1194_vm12, %v1427_v24  ;;  %v2131_v25 = vpop.permute.xlu0 %2130  ;;  %v1683_v34 = vsel %vm1082_vm11, %v1679_v58, 0.0  ;;  %v1680_v2 = vsel %vm1082_vm11, %v2774_v22, %v1679_v58 }
 0x388   : > { %v2133_v26 = vunpack.i.h.bf16 %v2131_v25  ;;  %v2132_v27 = vunpack.i.l.bf16 %v2131_v25  ;;  %v1685_v60 = vmul.f32 %v1683_v34, %v2610_v52  ;;  %v1628_v1 = vsel %vm1194_vm12, %v1622_v61, 0 }
 0x389   : > { %v1684_v52 = vmul.f32 %v1680_v2, %v2625_v6 }
 0x38a   : > { %v1182_v29 = vsel %vm561_vm2, %v2132_v27, %v2133_v26  ;;  %v1185_v30 = vsel %vm561_vm2, 0.0, %v2132_v27  ;;  %v1689_v63 = vpack.c.bf16 %v1685_v60, %v1685_v60 }
 0x38b   : > { %v1188_v31 = vpack.c.bf16 %v1185_v30, %v1185_v30  ;;  %v1189_v32 = vpack.c.bf16 %v1182_v29, %v1182_v29  ;;  %v1688_v3 = vpack.c.bf16 %v1684_v52, %v1684_v52 }
 0x38d   : > { %1918 = vmatprep.subr.msk.bf16.mxu1 %vm1194_vm12, %v1189_v32  ;;  %v1196_v35 = vsel %vm1194_vm12, %v1188_v31, 0  ;;  %v1694_v5 = vsel %vm1194_vm12, %v1688_v3, 0 }
 0x38e   : > { %1202 = vmatpush1.bf16.msra.mxu1 %v1196_v35 }
 0x391   : > { %1927 = vmatmul.mubr.msk.bf16.vlgmr.msra.gmra.mrb[4].mxu0 %vm1190_vm13, %v1925_v38  ;;  %1919 = vmatmul.mubr.msk.bf16.vlgmr.msra.gmra.mrb[4].mxu1 %vm1190_vm13, %v1917_v39 }
 0x392   : > { %1438 = vmatpush1.bf16.msra.mxu0 %v1432_v42  ;;  %1469 = vmatprep.mubr.bf16.mxu0 %v2280_v0 }
 0x393   : > { %1932 = vmatprep.subr.msk.bf16.mxu0 %vm1194_vm12, %v1493_v41 }
 0x397   : > { %v1746_v18 = vpop.permute.xlu1 %1745 }
 0x398   : > { %v1754_v22 = vpop.permute.xlu0 %1753 }
 0x39d   : > { %1930 = vmatmul.mubr.msk.bf16.vlgmr.msra.gmra.mrb[4].mxu0 %vm1190_vm13, %v1928_v47 }
 0x39e   : > { %1504 = vmatpush1.bf16.msra.mxu0 %v1498_v49  ;;  %1535 = vmatprep.mubr.bf16.mxu0 %v2280_v0 }
 0x39f   : > { %1935 = vmatprep.subr.msk.bf16.mxu0 %vm1194_vm12, %v1559_v48 }
 0x3a9   : > { %1933 = vmatmul.mubr.msk.bf16.vlgmr.msra.gmra.mrb[4].mxu0 %vm1190_vm13, %v1931_v54 }
 0x3aa   : > { %1570 = vmatpush1.bf16.msra.mxu0 %v1564_v56  ;;  %1601 = vmatprep.mubr.bf16.mxu0 %v2280_v0 }
 0x3ab   : > { %1938 = vmatprep.subr.msk.bf16.mxu0 %vm1194_vm12, %v1623_v55 }
 0x3b5   : > { %1936 = vmatmul.mubr.msk.bf16.vlgmr.msra.gmra.mrb[4].mxu0 %vm1190_vm13, %v1934_v62 }
 0x3b6   : > { %1634 = vmatpush1.bf16.msra.mxu0 %v1628_v1  ;;  %1665 = vmatprep.mubr.bf16.mxu0 %v2280_v0 }
 0x3b7   : > { %1941 = vmatprep.subr.msk.bf16.mxu0 %vm1194_vm12, %v1689_v63 }
 0x3c1   : > { %1939 = vmatmul.mubr.msk.bf16.vlgmr.msra.gmra.mrb[4].mxu0 %vm1190_vm13, %v1937_v4 }
 0x3c2   : > { %1700 = vmatpush1.bf16.msra.mxu0 %v1694_v5  ;;  %1731 = vmatprep.mubr.bf16.mxu0 %v2280_v0 }
 0x3cd   : > { %1942 = vmatmul.mubr.msk.bf16.vlgmr.msra.gmra.mrb[4].mxu0 %vm1190_vm13, %v1940_v9 }
 0x464   : > { %v1235_v10 = vpop.f32.mrb[4].mxu1 }
 0x465   : > { %v1237_v6 = vpop.f32.mrb[5].mxu1 }
 0x466   : > { %v1239_v11 = vpop.f32.mrb[6].mxu1 }
 0x467   : > { %v1240_v12 = vpop.f32.mrb[7].mxu1 }
 0x4a0   : > { %v1733_v13 = vpop.f32.mrb[4].mxu0 }
 0x4a1   : > { %v1950_v16 = vadd.f32 %v1733_v13, %v1235_v10  ;;  %v1735_v17 = vpop.f32.mrb[5].mxu0 }
 0x4a2   : > { %v1951_v19 = vadd.f32 %v1735_v17, %v1237_v6  ;;  %v1737_v20 = vpop.f32.mrb[6].mxu0 }
 0x4a3   : > { %v1748_v0 = vmul.f32 %v1950_v16, %v1746_v18  ;;  %v1738_v21 = vpop.f32.mrb[7].mxu0 }
 0x4a4   : > { %v1749_v23 = vmul.f32 %v1951_v19, %v1746_v18 }
 0x4a5   : > { %v1756_v24 = vadd.f32 %v1754_v22, %v1748_v0 }
 0x4a6   : > { %v1757_v25 = vadd.f32 %v1754_v22, %v1749_v23 }
 0x4a7   : > { %v1758_v26 = vmax.f32 %v1756_v24, 0.0 }
 0x4a8   : > { %v1759_v27 = vmax.f32 %v1757_v25, 0.0 }
 0x4a9   : > { %1760 = vst [vmem:[%s412_s27] sm:$0xff] %v1758_v26 }
 0x4aa   : > { %1761 = vst [vmem:[%s412_s27 + $0x8] sm:$0xff] %v1759_v27 }
 0x4ab   : > { %2219 = shalt.err (!%p2216_p0)
}
 0x4ac   : > { %s2220_s20 = scalar_lea.hbm %s2850_s23, 256  ;;  %s2224_s18 = scalar_lea.hbm %s2903_s10, 1024 }
 0x4ad   : > { %p2221_p10 = scmp.ne.s32.totalorder %s2850_s23, %s2220_s20  ;;  %p2225_p3 = scmp.lt.u32.totalorder %s2850_s23, %s2903_s10 }
 0x4ae   : > { %p2226_p9 = scmp.lt.u32.totalorder %s2224_s18, %s2220_s20  ;;  %p2228_p12 = scmp.lt.u32.totalorder %s2220_s20, %s2850_s23 }
 0x4af   : > { %p2222_p11 = pnand %p2221_p10, %p2926_p2 }
 0x4b0   : > { %p2227_p6 = por %p2226_p9, %p2225_p3 }
 0x4b1   : > { %p2223_p1 = pneg %p2222_p11 }
 0x4b2   : > { %p2229_p4 = por %p2228_p12, %p2227_p6 }
 0x4b4   : > { %p2230_p5 = pnand %p2229_p4, %p2223_p1 }
 0x4b6   : > { %2233 = shalt.err (!%p2230_p5)
}
 0x4b7   : > { %2016 = dma.vmem_to_hbm [thread:$0]  (%p2926_p2), %s2852_s24, 256, %s2850_s23, %s1763_s15  }
 0x4b8 PF: > { %p2030_p7 = scmp.ge.s32.totalorder %s2276_s16, 2  ;;  %s1789_s27 = sand.u32 1, %s2264_s13  }
 0x4b9   : > { %p2927_p8 = scmp.ne.s32.totalorder %s2916_s26, 0  ;;  %s1790_s0 = scalar_lea.sflag [#allocation4], %s1789_s27 }
 0x4bb   : > { %p2026_p13 = pnand %p2030_p7, %p2927_p8 }
 0x4bd   : > { %2259 = dma.done.wait (!%p2026_p13), %s1790_s0, 256  }
 0x4be   : > { %2261 = vsyncadd (!%p2026_p13), %s1790_s0, 4294967040  ;;  %s2928_s16 = sld [smem:[#allocation12_spill]]  ;;  %s2929_s21 = sld [smem:[#allocation11_spill]] }
 0x4bf   : > { %s2930_s15 = sld [smem:[#allocation13_spill]]  ;;  %s2931_s13 = smov %s2268_s14 }
 0x4c4   : > { %p26_p0 = scmp.ge.s32.totalorder %s2928_s16, 6   ;;  %s2932_s14 = smov %s2929_s21 }
 0x4c6   :  { %28 = sbr.rel (!%p26_p0) target bundleno = 9 (0x9), region = 135 }
 0x4cd   :  { %1795 = vsyncpa [#allocation3], 1 }
 0x4ce   :  { %1797 = vsyncpa [#allocation3 + $0x1], 1 }
 0x4cf   :  { %1798 = vsyncpa [#allocation6], 1 }
 0x4d0   :  { %1800 = vsyncpa [#allocation6 + $0x1], 1 }
 0x4d1   :  { %1801 = vsyncpa [#allocation4], 1 }
 0x4d2   :  { %1803 = vsyncpa [#allocation4 + $0x1], 1 }

</bundles_post_ra>
